<compile_context>
chip_gen: v7x
topology: tpu7x:2x2x1
jax: 0.10.0
libtpu: 0.0.40
codegen_flags: <defaults>
</compile_context>

<pallas_src>
import functools

import jax
import jax.numpy as jnp
from jax.experimental import pallas as pl
from jax.experimental.pallas import tpu as pltpu


def _round_up(x, m):
    return ((x + m - 1) // m) * m


def lstm_recurrence_kernel(gx_ref, w_hh_ref, out_ref, h_ref, c_ref, *,
                           act_dtype, unroll):
    # gx_ref  : (Tc, Bt, 4*Hp) bf16 -- precomputed x@W_ih^T + b, gate order [i,f,o,g]
    # w_hh_ref: (Hp, 4*Hp)     bf16 -- recurrent weights, gate order [i,f,o,g]
    # out_ref : (Bt, Hp)       f32  -- h at last timestep (written on last chunk)
    # h_ref/c_ref: (Bt, Hp)    f32 scratch -- LSTM state carried across time chunks
    t_chunk = pl.program_id(1)

    @pl.when(t_chunk == 0)
    def _init():
        h_ref[...] = jnp.zeros_like(h_ref)
        c_ref[...] = jnp.zeros_like(c_ref)

    Tc = gx_ref.shape[0]
    Hp = w_hh_ref.shape[0]
    w_hh = w_hh_ref[...]          # grid-invariant bf16 MXU operand (single-buffered)

    def step(t, carry):
        h, c = carry
        gx_t = gx_ref[t]          # (Bt, 4Hp) cheap per-step VMEM load
        gates = gx_t.astype(jnp.float32) + jnp.dot(
            h.astype(jnp.bfloat16), w_hh, preferred_element_type=jnp.float32)
        # Gate columns were permuted to [i, f, o, g]: one contiguous sigmoid slab.
        g_act = gates.astype(act_dtype)              # bf16 EUP on v6e/v7x, f32 on v5e
        sig = jax.nn.sigmoid(g_act[:, :3 * Hp]).astype(jnp.float32)
        g_g = jnp.tanh(g_act[:, 3 * Hp:]).astype(jnp.float32)
        i_g = sig[:, :Hp]
        f_g = sig[:, Hp:2 * Hp]
        o_g = sig[:, 2 * Hp:]
        c_new = f_g * c + i_g * g_g                  # f32 state update
        h_new = o_g * jnp.tanh(c_new)
        return h_new, c_new

    h_T, c_T = jax.lax.fori_loop(0, Tc, step, (h_ref[...], c_ref[...]),
                                 unroll=unroll)      # bounded unroll (vreg budget)
    h_ref[...] = h_T
    c_ref[...] = c_T

    @pl.when(t_chunk == pl.num_programs(1) - 1)
    def _finalize():
        out_ref[...] = h_T


def lstm_classification(x, w_ih, w_hh, b_ih, b_hh, w_fc, b_fc, *, time_chunk=32):
    """x: (B, T, D) float32 (batch_first, like PyTorch). Returns (B, 1) scores."""
    B, T, D = x.shape
    H = w_hh.shape[1]
    Hp = _round_up(H, 128)                        # lane-dense hidden dim

    # --- weights: PyTorch gate order [i, f, g, o] -> [i, f, o, g], pad H -> Hp ----
    def gate_blocks(w):                           # (4H, ...) -> i, f, g, o blocks
        return w[0:H], w[H:2 * H], w[2 * H:3 * H], w[3 * H:4 * H]

    wi, wf, wg, wo = gate_blocks(w_ih.astype(jnp.float32))         # (H, D) each
    hi, hf, hg, ho = gate_blocks(w_hh.astype(jnp.float32))         # (H, H) each
    bi, bff, bg, bo = gate_blocks((b_ih + b_hh).astype(jnp.float32))

    pad_o = ((0, Hp - H), (0, 0))                 # pad gate-output rows
    pad_oh = ((0, Hp - H), (0, Hp - H))           # pad output rows + h-input cols
    w_ih_p = jnp.concatenate(
        [jnp.pad(w, pad_o) for w in (wi, wf, wo, wg)], axis=0)     # (4Hp, D)
    w_hh_p = jnp.concatenate(
        [jnp.pad(w, pad_oh) for w in (hi, hf, ho, hg)], axis=0)    # (4Hp, Hp)
    b_p = jnp.concatenate(
        [jnp.pad(v, (0, Hp - H)) for v in (bi, bff, bo, bg)])      # (4Hp,)
    w_ih_t = w_ih_p.T                                              # (D, 4Hp)
    w_hh_t = w_hh_p.T.astype(jnp.bfloat16)                         # (Hp, 4Hp)

    # --- batch / time tiling ------------------------------------------------------
    Bt = min(128, _round_up(B, 16))    # >=16 (bf16 sublane); <=128 so B>128 gives
    Bp = _round_up(B, Bt)              # >=2 batch tiles for the two v7x TCs.
    n_chunks = pl.cdiv(T, max(1, time_chunk))
    Tc = pl.cdiv(T, n_chunks)          # minimal-padding chunk size
    Tp = n_chunks * Tc

    # --- hoisted input projection: ONE big bf16 MXU matmul, f32 accumulate --------
    # Pad/transpose the NARROW x (D-wide) — never the 4Hp-wide gates tensor.
    x_p = jnp.pad(x.astype(jnp.float32), ((0, Bp - B), (0, 0), (0, 0)))  # (Bp, T, D)
    x_t = jnp.transpose(x_p, (1, 0, 2)).reshape(T * Bp, D)               # (T*Bp, D)
    gx = jnp.dot(x_t.astype(jnp.bfloat16), w_ih_t.astype(jnp.bfloat16),
                 preferred_element_type=jnp.float32) + b_p               # (T*Bp, 4Hp)
    gx = gx.reshape(T, Bp, 4 * Hp)
    if Tp > T:
        # Front-pad with zero pre-activations: from zero state a zero-gate step
        # leaves (h, c) at exactly zero, so leading padded steps are inert.
        gx = jnp.pad(gx, ((Tp - T, 0), (0, 0), (0, 0)))
    gx = gx.astype(jnp.bfloat16)                                         # streamed bf16

    # --- device-adaptive knobs ----------------------------------------------------
    try:
        vmem_cap = pltpu.get_tpu_info().vmem_capacity_bytes
    except Exception:
        vmem_cap = 64 * 1024 * 1024
    vmem_limit = int(vmem_cap) * 3 // 4      # ~48 MiB on v7x, ~96 MiB on v5e/v6e
    try:
        kind = jax.devices()[0].device_kind.lower()
    except Exception:
        kind = ""
    is_v5e = ("v5e" in kind) or ("v5 lite" in kind) or ("v5lite" in kind)
    act_dtype = jnp.float32 if is_v5e else jnp.bfloat16   # bf16 EUP only on v6e/v7x

    grid = (Bp // Bt, Tp // Tc)        # (batch tiles: parallel, time chunks: serial)
    kernel = functools.partial(lstm_recurrence_kernel, act_dtype=act_dtype,
                               unroll=min(8, Tc))

    h_last = pl.pallas_call(
        kernel,
        out_shape=jax.ShapeDtypeStruct((Bp, Hp), jnp.float32),
        grid_spec=pltpu.PrefetchScalarGridSpec(
            num_scalar_prefetch=0,
            grid=grid,
            in_specs=[
                pl.BlockSpec((Tc, Bt, 4 * Hp), lambda bt, tc: (tc, bt, 0)),
                # Grid-invariant recurrent weights: single-buffer to save VMEM
                # (double-buffering an invariant operand is pure waste on v7x).
                pl.BlockSpec((Hp, 4 * Hp), lambda bt, tc: (0, 0),
                             pipeline_mode=pl.Buffered(1)),
            ],
            out_specs=pl.BlockSpec((Bt, Hp), lambda bt, tc: (bt, 0)),
            scratch_shapes=[
                pltpu.VMEM((Bt, Hp), jnp.float32),   # h state
                pltpu.VMEM((Bt, Hp), jnp.float32),   # c state
            ],
        ),
        compiler_params=pltpu.CompilerParams(
            dimension_semantics=("parallel", "arbitrary"),
            vmem_limit_bytes=vmem_limit,
        ),
    )(gx, w_hh_t)

    h_T = h_last[:B, :H]                                 # drop batch & lane padding
    # Dropout(p=0.5) in eval mode == identity.
    logits = h_T @ jnp.transpose(w_fc).astype(jnp.float32) + b_fc.astype(jnp.float32)
    return jax.nn.sigmoid(logits)                        # (B, 1)


def _reference(x, w_ih, w_hh, b_ih, b_hh, w_fc, b_fc):
    B, T, D = x.shape
    H = w_hh.shape[1]
    h = jnp.zeros((B, H), jnp.float32)
    c = jnp.zeros((B, H), jnp.float32)
    for t in range(T):
        g = x[:, t, :] @ w_ih.T + b_ih + h @ w_hh.T + b_hh
        i = jax.nn.sigmoid(g[:, 0:H])
        f = jax.nn.sigmoid(g[:, H:2 * H])
        gg = jnp.tanh(g[:, 2 * H:3 * H])
        o = jax.nn.sigmoid(g[:, 3 * H:4 * H])
        c = f * c + i * gg
        h = o * jnp.tanh(c)
    return jax.nn.sigmoid(h @ w_fc.T + b_fc)


if __name__ == "__main__":
    B, T, D, H = 2, 8, 4, 32

    key = jax.random.PRNGKey(0)
    ks = jax.random.split(key, 7)
    bound = 1.0 / jnp.sqrt(H)  # PyTorch LSTM/Linear default init range

    x = jax.random.normal(ks[0], (B, T, D), dtype=jnp.float32)
    w_ih = jax.random.uniform(ks[1], (4 * H, D), minval=-bound, maxval=bound)
    w_hh = jax.random.uniform(ks[2], (4 * H, H), minval=-bound, maxval=bound)
    b_ih = jax.random.uniform(ks[3], (4 * H,), minval=-bound, maxval=bound)
    b_hh = jax.random.uniform(ks[4], (4 * H,), minval=-bound, maxval=bound)
    w_fc = jax.random.uniform(ks[5], (1, H), minval=-bound, maxval=bound)
    b_fc = jax.random.uniform(ks[6], (1,), minval=-bound, maxval=bound)

    scores = lstm_classification(x, w_ih, w_hh, b_ih, b_hh, w_fc, b_fc)
    scores = jax.block_until_ready(scores)

    ref = _reference(x, w_ih, w_hh, b_ih, b_hh, w_fc, b_fc)
    assert scores.shape == (B, 1)
    # bf16 MXU operands + bf16 gate nonlinearities -> relaxed tolerance vs f32 ref.
    assert jnp.allclose(scores, ref, atol=2e-2, rtol=2e-2), (scores, ref)

    print("KERNEL_OK")
</pallas_src>

<mosaic_0001>
module attributes {stable_mosaic.version = 11 : i64} {
  func.func @lstm_recurrence_kernel(%arg0: i32, %arg1: i32, %arg2: memref<8x16x512xbf16, #tpu.memory_space<vmem>>, %arg3: memref<128x512xbf16, #tpu.memory_space<vmem>>, %arg4: memref<16x128xf32, #tpu.memory_space<vmem>>, %arg5: memref<16x128xf32, #tpu.memory_space<vmem>>, %arg6: memref<16x128xf32, #tpu.memory_space<vmem>>) attributes {dimension_semantics = [#tpu.dimension_semantics<parallel>, #tpu.dimension_semantics<arbitrary>], iteration_bounds = array<i64: 1, 1>, scalar_prefetch = 0 : i64, scratch_operands = 2 : i64, tpu.core_type = #tpu.core_type<tc>, window_params = [{transform_indices = @transform_0, window_bounds = array<i64: 8, 16, 512>}, {pipeline_mode = #tpu.pipeline_mode<synchronous>, transform_indices = @transform_1, window_bounds = array<i64: 128, 512>}, {transform_indices = @transform_2, window_bounds = array<i64: 16, 128>}]} {
    %c0_i32 = arith.constant 0 : i32
    %0 = arith.cmpi eq, %arg1, %c0_i32 : i32
    %1 = arith.extui %0 : i1 to i32
    %c0_i32_0 = arith.constant 0 : i32
    %2 = arith.cmpi ne, %1, %c0_i32_0 : i32
    scf.if %2 {
      %cst_44 = arith.constant 0.000000e+00 : f32
      %219 = vector.broadcast %cst_44 : f32 to vector<16x128xf32>
      %c0_45 = arith.constant 0 : index
      %c0_46 = arith.constant 0 : index
      %220 = vector.load %arg5[%c0_45, %c0_46] : memref<16x128xf32, #tpu.memory_space<vmem>>, vector<16x128xf32>
      tpu.vector_store %arg5[%c0_45, %c0_46], %219 {strides = array<i32>} : memref<16x128xf32, #tpu.memory_space<vmem>>, vector<16x128xf32>,
      %cst_47 = arith.constant 0.000000e+00 : f32
      %221 = vector.broadcast %cst_47 : f32 to vector<16x128xf32>
      %c0_48 = arith.constant 0 : index
      %c0_49 = arith.constant 0 : index
      %222 = vector.load %arg6[%c0_48, %c0_49] : memref<16x128xf32, #tpu.memory_space<vmem>>, vector<16x128xf32>
      tpu.vector_store %arg6[%c0_48, %c0_49], %221 {strides = array<i32>} : memref<16x128xf32, #tpu.memory_space<vmem>>, vector<16x128xf32>,
    } else {
    }
    %c0 = arith.constant 0 : index
    %c0_1 = arith.constant 0 : index
    %3 = vector.load %arg3[%c0, %c0_1] : memref<128x512xbf16, #tpu.memory_space<vmem>>, vector<128x512xbf16>
    %c0_2 = arith.constant 0 : index
    %c0_3 = arith.constant 0 : index
    %4 = vector.load %arg5[%c0_2, %c0_3] : memref<16x128xf32, #tpu.memory_space<vmem>>, vector<16x128xf32>
    %c0_4 = arith.constant 0 : index
    %c0_5 = arith.constant 0 : index
    %5 = vector.load %arg6[%c0_4, %c0_5] : memref<16x128xf32, #tpu.memory_space<vmem>>, vector<16x128xf32>
    %c0_i32_6 = arith.constant 0 : i32
    %6 = arith.index_cast %c0_i32_6 : i32 to index
    %c0_7 = arith.constant 0 : index
    %c0_8 = arith.constant 0 : index
    %7 = vector.load %arg2[%6, %c0_7, %c0_8] : memref<8x16x512xbf16, #tpu.memory_space<vmem>>, vector<1x16x512xbf16>
    %8 = vector.shape_cast %7 : vector<1x16x512xbf16> to vector<16x512xbf16>
    %9 = arith.extf %8 : vector<16x512xbf16> to vector<16x512xf32>
    %10 = arith.truncf %4 : vector<16x128xf32> to vector<16x128xbf16>
    %cst = arith.constant dense<0.000000e+00> : vector<16x512xf32>
    %11 = tpu.matmul %10, %3, %cst {dimension_numbers = #tpu.dot_dimension_numbers<[1], [0], [0], [1], [0, 0, 1, 1], [], []>} : vector<16x128xbf16>, vector<128x512xbf16>, vector<16x512xf32> -> vector<16x512xf32>
    %12 = arith.addf %9, %11 : vector<16x512xf32>
    %13 = arith.truncf %12 : vector<16x512xf32> to vector<16x512xbf16>
    %14 = vector.extract_strided_slice %13 {offsets = [0, 0], sizes = [16, 384], strides = [1, 1]} : vector<16x512xbf16> to vector<16x384xbf16>
    %15 = arith.negf %14 : vector<16x384xbf16>
    %16 = math.exp %15 : vector<16x384xbf16>
    %cst_9 = arith.constant 1.000000e+00 : bf16
    %17 = vector.broadcast %cst_9 : bf16 to vector<16x384xbf16>
    %18 = arith.addf %17, %16 : vector<16x384xbf16>
    %19 = arith.divf %17, %18 : vector<16x384xbf16>
    %20 = arith.extf %19 : vector<16x384xbf16> to vector<16x384xf32>
    %21 = vector.extract_strided_slice %13 {offsets = [0, 384], sizes = [16, 128], strides = [1, 1]} : vector<16x512xbf16> to vector<16x128xbf16>
    %22 = math.tanh %21 : vector<16x128xbf16>
    %23 = arith.extf %22 : vector<16x128xbf16> to vector<16x128xf32>
    %24 = vector.extract_strided_slice %20 {offsets = [0, 0], sizes = [16, 128], strides = [1, 1]} : vector<16x384xf32> to vector<16x128xf32>
    %25 = vector.extract_strided_slice %20 {offsets = [0, 128], sizes = [16, 128], strides = [1, 1]} : vector<16x384xf32> to vector<16x128xf32>
    %26 = vector.extract_strided_slice %20 {offsets = [0, 256], sizes = [16, 128], strides = [1, 1]} : vector<16x384xf32> to vector<16x128xf32>
    %27 = arith.mulf %25, %5 : vector<16x128xf32>
    %28 = arith.mulf %24, %23 : vector<16x128xf32>
    %29 = arith.addf %27, %28 : vector<16x128xf32>
    %30 = math.tanh %29 : vector<16x128xf32>
    %31 = arith.mulf %26, %30 : vector<16x128xf32>
    %c1_i32 = arith.constant 1 : i32
    %32 = arith.index_cast %c1_i32 : i32 to index
    %c0_10 = arith.constant 0 : index
    %c0_11 = arith.constant 0 : index
    %33 = vector.load %arg2[%32, %c0_10, %c0_11] : memref<8x16x512xbf16, #tpu.memory_space<vmem>>, vector<1x16x512xbf16>
    %34 = vector.shape_cast %33 : vector<1x16x512xbf16> to vector<16x512xbf16>
    %35 = arith.extf %34 : vector<16x512xbf16> to vector<16x512xf32>
    %36 = arith.truncf %31 : vector<16x128xf32> to vector<16x128xbf16>
    %cst_12 = arith.constant dense<0.000000e+00> : vector<16x512xf32>
    %37 = tpu.matmul %36, %3, %cst_12 {dimension_numbers = #tpu.dot_dimension_numbers<[1], [0], [0], [1], [0, 0, 1, 1], [], []>} : vector<16x128xbf16>, vector<128x512xbf16>, vector<16x512xf32> -> vector<16x512xf32>
    %38 = arith.addf %35, %37 : vector<16x512xf32>
    %39 = arith.truncf %38 : vector<16x512xf32> to vector<16x512xbf16>
    %40 = vector.extract_strided_slice %39 {offsets = [0, 0], sizes = [16, 384], strides = [1, 1]} : vector<16x512xbf16> to vector<16x384xbf16>
    %41 = arith.negf %40 : vector<16x384xbf16>
    %42 = math.exp %41 : vector<16x384xbf16>
    %cst_13 = arith.constant 1.000000e+00 : bf16
    %43 = vector.broadcast %cst_13 : bf16 to vector<16x384xbf16>
    %44 = arith.addf %43, %42 : vector<16x384xbf16>
    %45 = arith.divf %43, %44 : vector<16x384xbf16>
    %46 = arith.extf %45 : vector<16x384xbf16> to vector<16x384xf32>
    %47 = vector.extract_strided_slice %39 {offsets = [0, 384], sizes = [16, 128], strides = [1, 1]} : vector<16x512xbf16> to vector<16x128xbf16>
    %48 = math.tanh %47 : vector<16x128xbf16>
    %49 = arith.extf %48 : vector<16x128xbf16> to vector<16x128xf32>
    %50 = vector.extract_strided_slice %46 {offsets = [0, 0], sizes = [16, 128], strides = [1, 1]} : vector<16x384xf32> to vector<16x128xf32>
    %51 = vector.extract_strided_slice %46 {offsets = [0, 128], sizes = [16, 128], strides = [1, 1]} : vector<16x384xf32> to vector<16x128xf32>
    %52 = vector.extract_strided_slice %46 {offsets = [0, 256], sizes = [16, 128], strides = [1, 1]} : vector<16x384xf32> to vector<16x128xf32>
    %53 = arith.mulf %51, %29 : vector<16x128xf32>
    %54 = arith.mulf %50, %49 : vector<16x128xf32>
    %55 = arith.addf %53, %54 : vector<16x128xf32>
    %56 = math.tanh %55 : vector<16x128xf32>
    %57 = arith.mulf %52, %56 : vector<16x128xf32>
    %c2_i32 = arith.constant 2 : i32
    %58 = arith.index_cast %c2_i32 : i32 to index
    %c0_14 = arith.constant 0 : index
    %c0_15 = arith.constant 0 : index
    %59 = vector.load %arg2[%58, %c0_14, %c0_15] : memref<8x16x512xbf16, #tpu.memory_space<vmem>>, vector<1x16x512xbf16>
    %60 = vector.shape_cast %59 : vector<1x16x512xbf16> to vector<16x512xbf16>
    %61 = arith.extf %60 : vector<16x512xbf16> to vector<16x512xf32>
    %62 = arith.truncf %57 : vector<16x128xf32> to vector<16x128xbf16>
    %cst_16 = arith.constant dense<0.000000e+00> : vector<16x512xf32>
    %63 = tpu.matmul %62, %3, %cst_16 {dimension_numbers = #tpu.dot_dimension_numbers<[1], [0], [0], [1], [0, 0, 1, 1], [], []>} : vector<16x128xbf16>, vector<128x512xbf16>, vector<16x512xf32> -> vector<16x512xf32>
    %64 = arith.addf %61, %63 : vector<16x512xf32>
    %65 = arith.truncf %64 : vector<16x512xf32> to vector<16x512xbf16>
    %66 = vector.extract_strided_slice %65 {offsets = [0, 0], sizes = [16, 384], strides = [1, 1]} : vector<16x512xbf16> to vector<16x384xbf16>
    %67 = arith.negf %66 : vector<16x384xbf16>
    %68 = math.exp %67 : vector<16x384xbf16>
    %cst_17 = arith.constant 1.000000e+00 : bf16
    %69 = vector.broadcast %cst_17 : bf16 to vector<16x384xbf16>
    %70 = arith.addf %69, %68 : vector<16x384xbf16>
    %71 = arith.divf %69, %70 : vector<16x384xbf16>
    %72 = arith.extf %71 : vector<16x384xbf16> to vector<16x384xf32>
    %73 = vector.extract_strided_slice %65 {offsets = [0, 384], sizes = [16, 128], strides = [1, 1]} : vector<16x512xbf16> to vector<16x128xbf16>
    %74 = math.tanh %73 : vector<16x128xbf16>
    %75 = arith.extf %74 : vector<16x128xbf16> to vector<16x128xf32>
    %76 = vector.extract_strided_slice %72 {offsets = [0, 0], sizes = [16, 128], strides = [1, 1]} : vector<16x384xf32> to vector<16x128xf32>
    %77 = vector.extract_strided_slice %72 {offsets = [0, 128], sizes = [16, 128], strides = [1, 1]} : vector<16x384xf32> to vector<16x128xf32>
    %78 = vector.extract_strided_slice %72 {offsets = [0, 256], sizes = [16, 128], strides = [1, 1]} : vector<16x384xf32> to vector<16x128xf32>
    %79 = arith.mulf %77, %55 : vector<16x128xf32>
    %80 = arith.mulf %76, %75 : vector<16x128xf32>
    %81 = arith.addf %79, %80 : vector<16x128xf32>
    %82 = math.tanh %81 : vector<16x128xf32>
    %83 = arith.mulf %78, %82 : vector<16x128xf32>
    %c3_i32 = arith.constant 3 : i32
    %84 = arith.index_cast %c3_i32 : i32 to index
    %c0_18 = arith.constant 0 : index
    %c0_19 = arith.constant 0 : index
    %85 = vector.load %arg2[%84, %c0_18, %c0_19] : memref<8x16x512xbf16, #tpu.memory_space<vmem>>, vector<1x16x512xbf16>
    %86 = vector.shape_cast %85 : vector<1x16x512xbf16> to vector<16x512xbf16>
    %87 = arith.extf %86 : vector<16x512xbf16> to vector<16x512xf32>
    %88 = arith.truncf %83 : vector<16x128xf32> to vector<16x128xbf16>
    %cst_20 = arith.constant dense<0.000000e+00> : vector<16x512xf32>
    %89 = tpu.matmul %88, %3, %cst_20 {dimension_numbers = #tpu.dot_dimension_numbers<[1], [0], [0], [1], [0, 0, 1, 1], [], []>} : vector<16x128xbf16>, vector<128x512xbf16>, vector<16x512xf32> -> vector<16x512xf32>
    %90 = arith.addf %87, %89 : vector<16x512xf32>
    %91 = arith.truncf %90 : vector<16x512xf32> to vector<16x512xbf16>
    %92 = vector.extract_strided_slice %91 {offsets = [0, 0], sizes = [16, 384], strides = [1, 1]} : vector<16x512xbf16> to vector<16x384xbf16>
    %93 = arith.negf %92 : vector<16x384xbf16>
    %94 = math.exp %93 : vector<16x384xbf16>
    %cst_21 = arith.constant 1.000000e+00 : bf16
    %95 = vector.broadcast %cst_21 : bf16 to vector<16x384xbf16>
    %96 = arith.addf %95, %94 : vector<16x384xbf16>
    %97 = arith.divf %95, %96 : vector<16x384xbf16>
    %98 = arith.extf %97 : vector<16x384xbf16> to vector<16x384xf32>
    %99 = vector.extract_strided_slice %91 {offsets = [0, 384], sizes = [16, 128], strides = [1, 1]} : vector<16x512xbf16> to vector<16x128xbf16>
    %100 = math.tanh %99 : vector<16x128xbf16>
    %101 = arith.extf %100 : vector<16x128xbf16> to vector<16x128xf32>
    %102 = vector.extract_strided_slice %98 {offsets = [0, 0], sizes = [16, 128], strides = [1, 1]} : vector<16x384xf32> to vector<16x128xf32>
    %103 = vector.extract_strided_slice %98 {offsets = [0, 128], sizes = [16, 128], strides = [1, 1]} : vector<16x384xf32> to vector<16x128xf32>
    %104 = vector.extract_strided_slice %98 {offsets = [0, 256], sizes = [16, 128], strides = [1, 1]} : vector<16x384xf32> to vector<16x128xf32>
    %105 = arith.mulf %103, %81 : vector<16x128xf32>
    %106 = arith.mulf %102, %101 : vector<16x128xf32>
    %107 = arith.addf %105, %106 : vector<16x128xf32>
    %108 = math.tanh %107 : vector<16x128xf32>
    %109 = arith.mulf %104, %108 : vector<16x128xf32>
    %c4_i32 = arith.constant 4 : i32
    %110 = arith.index_cast %c4_i32 : i32 to index
    %c0_22 = arith.constant 0 : index
    %c0_23 = arith.constant 0 : index
    %111 = vector.load %arg2[%110, %c0_22, %c0_23] : memref<8x16x512xbf16, #tpu.memory_space<vmem>>, vector<1x16x512xbf16>
    %112 = vector.shape_cast %111 : vector<1x16x512xbf16> to vector<16x512xbf16>
    %113 = arith.extf %112 : vector<16x512xbf16> to vector<16x512xf32>
    %114 = arith.truncf %109 : vector<16x128xf32> to vector<16x128xbf16>
    %cst_24 = arith.constant dense<0.000000e+00> : vector<16x512xf32>
    %115 = tpu.matmul %114, %3, %cst_24 {dimension_numbers = #tpu.dot_dimension_numbers<[1], [0], [0], [1], [0, 0, 1, 1], [], []>} : vector<16x128xbf16>, vector<128x512xbf16>, vector<16x512xf32> -> vector<16x512xf32>
    %116 = arith.addf %113, %115 : vector<16x512xf32>
    %117 = arith.truncf %116 : vector<16x512xf32> to vector<16x512xbf16>
    %118 = vector.extract_strided_slice %117 {offsets = [0, 0], sizes = [16, 384], strides = [1, 1]} : vector<16x512xbf16> to vector<16x384xbf16>
    %119 = arith.negf %118 : vector<16x384xbf16>
    %120 = math.exp %119 : vector<16x384xbf16>
    %cst_25 = arith.constant 1.000000e+00 : bf16
    %121 = vector.broadcast %cst_25 : bf16 to vector<16x384xbf16>
    %122 = arith.addf %121, %120 : vector<16x384xbf16>
    %123 = arith.divf %121, %122 : vector<16x384xbf16>
    %124 = arith.extf %123 : vector<16x384xbf16> to vector<16x384xf32>
    %125 = vector.extract_strided_slice %117 {offsets = [0, 384], sizes = [16, 128], strides = [1, 1]} : vector<16x512xbf16> to vector<16x128xbf16>
    %126 = math.tanh %125 : vector<16x128xbf16>
    %127 = arith.extf %126 : vector<16x128xbf16> to vector<16x128xf32>
    %128 = vector.extract_strided_slice %124 {offsets = [0, 0], sizes = [16, 128], strides = [1, 1]} : vector<16x384xf32> to vector<16x128xf32>
    %129 = vector.extract_strided_slice %124 {offsets = [0, 128], sizes = [16, 128], strides = [1, 1]} : vector<16x384xf32> to vector<16x128xf32>
    %130 = vector.extract_strided_slice %124 {offsets = [0, 256], sizes = [16, 128], strides = [1, 1]} : vector<16x384xf32> to vector<16x128xf32>
    %131 = arith.mulf %129, %107 : vector<16x128xf32>
    %132 = arith.mulf %128, %127 : vector<16x128xf32>
    %133 = arith.addf %131, %132 : vector<16x128xf32>
    %134 = math.tanh %133 : vector<16x128xf32>
    %135 = arith.mulf %130, %134 : vector<16x128xf32>
    %c5_i32 = arith.constant 5 : i32
    %136 = arith.index_cast %c5_i32 : i32 to index
    %c0_26 = arith.constant 0 : index
    %c0_27 = arith.constant 0 : index
    %137 = vector.load %arg2[%136, %c0_26, %c0_27] : memref<8x16x512xbf16, #tpu.memory_space<vmem>>, vector<1x16x512xbf16>
    %138 = vector.shape_cast %137 : vector<1x16x512xbf16> to vector<16x512xbf16>
    %139 = arith.extf %138 : vector<16x512xbf16> to vector<16x512xf32>
    %140 = arith.truncf %135 : vector<16x128xf32> to vector<16x128xbf16>
    %cst_28 = arith.constant dense<0.000000e+00> : vector<16x512xf32>
    %141 = tpu.matmul %140, %3, %cst_28 {dimension_numbers = #tpu.dot_dimension_numbers<[1], [0], [0], [1], [0, 0, 1, 1], [], []>} : vector<16x128xbf16>, vector<128x512xbf16>, vector<16x512xf32> -> vector<16x512xf32>
    %142 = arith.addf %139, %141 : vector<16x512xf32>
    %143 = arith.truncf %142 : vector<16x512xf32> to vector<16x512xbf16>
    %144 = vector.extract_strided_slice %143 {offsets = [0, 0], sizes = [16, 384], strides = [1, 1]} : vector<16x512xbf16> to vector<16x384xbf16>
    %145 = arith.negf %144 : vector<16x384xbf16>
    %146 = math.exp %145 : vector<16x384xbf16>
    %cst_29 = arith.constant 1.000000e+00 : bf16
    %147 = vector.broadcast %cst_29 : bf16 to vector<16x384xbf16>
    %148 = arith.addf %147, %146 : vector<16x384xbf16>
    %149 = arith.divf %147, %148 : vector<16x384xbf16>
    %150 = arith.extf %149 : vector<16x384xbf16> to vector<16x384xf32>
    %151 = vector.extract_strided_slice %143 {offsets = [0, 384], sizes = [16, 128], strides = [1, 1]} : vector<16x512xbf16> to vector<16x128xbf16>
    %152 = math.tanh %151 : vector<16x128xbf16>
    %153 = arith.extf %152 : vector<16x128xbf16> to vector<16x128xf32>
    %154 = vector.extract_strided_slice %150 {offsets = [0, 0], sizes = [16, 128], strides = [1, 1]} : vector<16x384xf32> to vector<16x128xf32>
    %155 = vector.extract_strided_slice %150 {offsets = [0, 128], sizes = [16, 128], strides = [1, 1]} : vector<16x384xf32> to vector<16x128xf32>
    %156 = vector.extract_strided_slice %150 {offsets = [0, 256], sizes = [16, 128], strides = [1, 1]} : vector<16x384xf32> to vector<16x128xf32>
    %157 = arith.mulf %155, %133 : vector<16x128xf32>
    %158 = arith.mulf %154, %153 : vector<16x128xf32>
    %159 = arith.addf %157, %158 : vector<16x128xf32>
    %160 = math.tanh %159 : vector<16x128xf32>
    %161 = arith.mulf %156, %160 : vector<16x128xf32>
    %c6_i32 = arith.constant 6 : i32
    %162 = arith.index_cast %c6_i32 : i32 to index
    %c0_30 = arith.constant 0 : index
    %c0_31 = arith.constant 0 : index
    %163 = vector.load %arg2[%162, %c0_30, %c0_31] : memref<8x16x512xbf16, #tpu.memory_space<vmem>>, vector<1x16x512xbf16>
    %164 = vector.shape_cast %163 : vector<1x16x512xbf16> to vector<16x512xbf16>
    %165 = arith.extf %164 : vector<16x512xbf16> to vector<16x512xf32>
    %166 = arith.truncf %161 : vector<16x128xf32> to vector<16x128xbf16>
    %cst_32 = arith.constant dense<0.000000e+00> : vector<16x512xf32>
    %167 = tpu.matmul %166, %3, %cst_32 {dimension_numbers = #tpu.dot_dimension_numbers<[1], [0], [0], [1], [0, 0, 1, 1], [], []>} : vector<16x128xbf16>, vector<128x512xbf16>, vector<16x512xf32> -> vector<16x512xf32>
    %168 = arith.addf %165, %167 : vector<16x512xf32>
    %169 = arith.truncf %168 : vector<16x512xf32> to vector<16x512xbf16>
    %170 = vector.extract_strided_slice %169 {offsets = [0, 0], sizes = [16, 384], strides = [1, 1]} : vector<16x512xbf16> to vector<16x384xbf16>
    %171 = arith.negf %170 : vector<16x384xbf16>
    %172 = math.exp %171 : vector<16x384xbf16>
    %cst_33 = arith.constant 1.000000e+00 : bf16
    %173 = vector.broadcast %cst_33 : bf16 to vector<16x384xbf16>
    %174 = arith.addf %173, %172 : vector<16x384xbf16>
    %175 = arith.divf %173, %174 : vector<16x384xbf16>
    %176 = arith.extf %175 : vector<16x384xbf16> to vector<16x384xf32>
    %177 = vector.extract_strided_slice %169 {offsets = [0, 384], sizes = [16, 128], strides = [1, 1]} : vector<16x512xbf16> to vector<16x128xbf16>
    %178 = math.tanh %177 : vector<16x128xbf16>
    %179 = arith.extf %178 : vector<16x128xbf16> to vector<16x128xf32>
    %180 = vector.extract_strided_slice %176 {offsets = [0, 0], sizes = [16, 128], strides = [1, 1]} : vector<16x384xf32> to vector<16x128xf32>
    %181 = vector.extract_strided_slice %176 {offsets = [0, 128], sizes = [16, 128], strides = [1, 1]} : vector<16x384xf32> to vector<16x128xf32>
    %182 = vector.extract_strided_slice %176 {offsets = [0, 256], sizes = [16, 128], strides = [1, 1]} : vector<16x384xf32> to vector<16x128xf32>
    %183 = arith.mulf %181, %159 : vector<16x128xf32>
    %184 = arith.mulf %180, %179 : vector<16x128xf32>
    %185 = arith.addf %183, %184 : vector<16x128xf32>
    %186 = math.tanh %185 : vector<16x128xf32>
    %187 = arith.mulf %182, %186 : vector<16x128xf32>
    %c7_i32 = arith.constant 7 : i32
    %188 = arith.index_cast %c7_i32 : i32 to index
    %c0_34 = arith.constant 0 : index
    %c0_35 = arith.constant 0 : index
    %189 = vector.load %arg2[%188, %c0_34, %c0_35] : memref<8x16x512xbf16, #tpu.memory_space<vmem>>, vector<1x16x512xbf16>
    %190 = vector.shape_cast %189 : vector<1x16x512xbf16> to vector<16x512xbf16>
    %191 = arith.extf %190 : vector<16x512xbf16> to vector<16x512xf32>
    %192 = arith.truncf %187 : vector<16x128xf32> to vector<16x128xbf16>
    %cst_36 = arith.constant dense<0.000000e+00> : vector<16x512xf32>
    %193 = tpu.matmul %192, %3, %cst_36 {dimension_numbers = #tpu.dot_dimension_numbers<[1], [0], [0], [1], [0, 0, 1, 1], [], []>} : vector<16x128xbf16>, vector<128x512xbf16>, vector<16x512xf32> -> vector<16x512xf32>
    %194 = arith.addf %191, %193 : vector<16x512xf32>
    %195 = arith.truncf %194 : vector<16x512xf32> to vector<16x512xbf16>
    %196 = vector.extract_strided_slice %195 {offsets = [0, 0], sizes = [16, 384], strides = [1, 1]} : vector<16x512xbf16> to vector<16x384xbf16>
    %197 = arith.negf %196 : vector<16x384xbf16>
    %198 = math.exp %197 : vector<16x384xbf16>
    %cst_37 = arith.constant 1.000000e+00 : bf16
    %199 = vector.broadcast %cst_37 : bf16 to vector<16x384xbf16>
    %200 = arith.addf %199, %198 : vector<16x384xbf16>
    %201 = arith.divf %199, %200 : vector<16x384xbf16>
    %202 = arith.extf %201 : vector<16x384xbf16> to vector<16x384xf32>
    %203 = vector.extract_strided_slice %195 {offsets = [0, 384], sizes = [16, 128], strides = [1, 1]} : vector<16x512xbf16> to vector<16x128xbf16>
    %204 = math.tanh %203 : vector<16x128xbf16>
    %205 = arith.extf %204 : vector<16x128xbf16> to vector<16x128xf32>
    %206 = vector.extract_strided_slice %202 {offsets = [0, 0], sizes = [16, 128], strides = [1, 1]} : vector<16x384xf32> to vector<16x128xf32>
    %207 = vector.extract_strided_slice %202 {offsets = [0, 128], sizes = [16, 128], strides = [1, 1]} : vector<16x384xf32> to vector<16x128xf32>
    %208 = vector.extract_strided_slice %202 {offsets = [0, 256], sizes = [16, 128], strides = [1, 1]} : vector<16x384xf32> to vector<16x128xf32>
    %209 = arith.mulf %207, %185 : vector<16x128xf32>
    %210 = arith.mulf %206, %205 : vector<16x128xf32>
    %211 = arith.addf %209, %210 : vector<16x128xf32>
    %212 = math.tanh %211 : vector<16x128xf32>
    %213 = arith.mulf %208, %212 : vector<16x128xf32>
    %c8_i32 = arith.constant 8 : i32
    %c0_38 = arith.constant 0 : index
    %c0_39 = arith.constant 0 : index
    %214 = vector.load %arg5[%c0_38, %c0_39] : memref<16x128xf32, #tpu.memory_space<vmem>>, vector<16x128xf32>
    tpu.vector_store %arg5[%c0_38, %c0_39], %213 {strides = array<i32>} : memref<16x128xf32, #tpu.memory_space<vmem>>, vector<16x128xf32>,
    %c0_40 = arith.constant 0 : index
    %c0_41 = arith.constant 0 : index
    %215 = vector.load %arg6[%c0_40, %c0_41] : memref<16x128xf32, #tpu.memory_space<vmem>>, vector<16x128xf32>
    tpu.vector_store %arg6[%c0_40, %c0_41], %211 {strides = array<i32>} : memref<16x128xf32, #tpu.memory_space<vmem>>, vector<16x128xf32>,
    %c0_i32_42 = arith.constant 0 : i32
    %216 = arith.cmpi eq, %arg1, %c0_i32_42 : i32
    %217 = arith.extui %216 : i1 to i32
    %c0_i32_43 = arith.constant 0 : i32
    %218 = arith.cmpi ne, %217, %c0_i32_43 : i32
    scf.if %218 {
      %c0_44 = arith.constant 0 : index
      %c0_45 = arith.constant 0 : index
      %219 = vector.load %arg4[%c0_44, %c0_45] : memref<16x128xf32, #tpu.memory_space<vmem>>, vector<16x128xf32>
      tpu.vector_store %arg4[%c0_44, %c0_45], %213 {strides = array<i32>} : memref<16x128xf32, #tpu.memory_space<vmem>>, vector<16x128xf32>,
    } else {
    }
    return
  }
  func.func @transform_0(%arg0: i32, %arg1: i32) -> (i32, i32, i32) {
    %c0_i32 = arith.constant 0 : i32
    %c0_i32_0 = arith.constant 0 : i32
    return %arg1, %arg0, %c0_i32 : i32, i32, i32
  }
  func.func @transform_1(%arg0: i32, %arg1: i32) -> (i32, i32) {
    %c0_i32 = arith.constant 0 : i32
    %c0_i32_0 = arith.constant 0 : i32
    %c0_i32_1 = arith.constant 0 : i32
    return %c0_i32, %c0_i32_0 : i32, i32
  }
  func.func @transform_2(%arg0: i32, %arg1: i32) -> (i32, i32) {
    %c0_i32 = arith.constant 0 : i32
    %c0_i32_0 = arith.constant 0 : i32
    return %arg0, %c0_i32 : i32, i32
  }
}

</mosaic_0001>

<bundles_post_ra>
// kernel: tpu_custom_call.1
= control target key start
LH: loop header
LB: loop body
LE: loop exit
PB: predicated region body
PF: predicated region fallthrough
CT: control target
= control target key end

     0   :  { %7 = vsyncpa [#allocation5], 0  ;;  %s2365_s0 = inlined_call_operand.hbm [shape: bf16[8,16,512], index: 0, kind: input, shape index: {}]   ;;  %s2366_s1 = inlined_call_operand.hbm [shape: bf16[128,512], index: 1, kind: input, shape index: {}]   ;;  %s2367_s2 = inlined_call_operand.hbm [shape: f32[16,128], index: 2, kind: output, shape index: {}]  }
   0x1   :  { %8 = vsyncpa [#allocation8], 0 }
   0x2   :  { %9 = vsyncpa [#allocation6], 0  ;;  %s1849_s9 = smov [#allocation4]   ;;  %s1777_s13 = scalar_lea.hbm %s2365_s0, 4096 }
   0x3   :  { %s15_s10 = sshll.u32 %s1849_s9, 4  ;;  %p1778_p0 = scmp.ne.s32.totalorder %s2365_s0, %s1777_s13  ;;  %s16_s10 = int_to_ptr.vmem [resolvable:$true] %s15_s10 }
   0x4   :  { %p1781_p1 = scmp.lt.u32.totalorder %s1777_s13, %s2365_s0 }
   0x6   :  { %p1783_p2 = pnand %p1781_p1, %p1778_p0 }
   0x8   :  { %1786 = shalt.err (!%p1783_p2)
}
   0x9   :  { %s1787_s18 = scalar_lea.vmem %s16_s10, 4096  ;;  %p1792_p4 = scmp.lt.s32.totalorder %s16_s10, %s16_s10 }
   0xa   :  { %p1788_p3 = scmp.ne.s32.totalorder %s16_s10, %s1787_s18  ;;  %p1793_p5 = scmp.lt.s32.totalorder %s1787_s18, %s1787_s18 }
   0xc   :  { %p1794_p6 = por %p1793_p5, %p1792_p4 }
   0xe   :  { %p1795_p7 = pnand %p1794_p6, %p1788_p3 }
  0x10   :  { %1798 = shalt.err (!%p1795_p7)
}
  0x11   :  { %s1850_s19 = smov 256   ;;  %s1851_s20 = smov 16  }
  0x12   :  { %21 = dma.hbm_to_vmem [thread:$0]  %s2365_s0, 4096, %s16_s10, [#allocation5], %s1850_s19, %s1850_s19, %s1851_s20  }
  0x13   :  { %s1852_s23 = smov [#allocation7]   ;;  %s1799_s27 = scalar_lea.hbm %s2366_s1, 4096 }
  0x14   :  { %s27_s24 = sshll.u32 %s1852_s23, 4  ;;  %p1800_p8 = scmp.ne.s32.totalorder %s2366_s1, %s1799_s27  ;;  %s28_s24 = int_to_ptr.vmem [resolvable:$true] %s27_s24 }
  0x15   :  { %p1803_p9 = scmp.lt.u32.totalorder %s1799_s27, %s2366_s1 }
  0x17   :  { %p1805_p10 = pnand %p1803_p9, %p1800_p8 }
  0x19   :  { %1808 = shalt.err (!%p1805_p10)
}
  0x1a   :  { %s1809_s4 = scalar_lea.vmem %s28_s24, 4096  ;;  %p1814_p12 = scmp.lt.s32.totalorder %s28_s24, %s28_s24 }
  0x1b   :  { %p1810_p11 = scmp.ne.s32.totalorder %s28_s24, %s1809_s4  ;;  %p1815_p13 = scmp.lt.s32.totalorder %s1809_s4, %s1809_s4 }
  0x1d   :  { %p1816_p0 = por %p1815_p13, %p1814_p12 }
  0x1f   :  { %p1817_p1 = pnand %p1816_p0, %p1810_p11 }
  0x21   :  { %1820 = shalt.err (!%p1817_p1)
}
  0x22   :  { %33 = dma.hbm_to_vmem [thread:$0]  %s2366_s1, 4096, %s28_s24, [#allocation8], %s1850_s19, %s1850_s19, %s1851_s20  }
  0x23   :  { %1843 = dma.done.wait [#allocation5], 4096  }
  0x24   :  { %1844 = vsyncadd [#allocation5], 4294963200 }
  0x25   :  { %1845 = dma.done.wait [#allocation8], 4096  }
  0x26   :  { %1846 = vsyncadd [#allocation8], 4294963200  ;;  %v2368_v0 = vmov 0   ;;  %v1899_v1 = vld [vmem:[#allocation7 + $0x4] ss:$16 sps:$4 sm:$0xff]   ;;  %v1854_v33 = vmov 0.0|0.0  }
  0x27   :  { %291 = vmatprep.mubr.bf16.mxu0 %v2368_v0  ;;  %334 = vmatprep.mubr.bf16.mxu1 %v2368_v0  ;;  %2373 = vst [vmem:[#allocation13_spill] sm:$0xff] %v1899_v1  ;;  %v1901_v2 = vld [vmem:[#allocation7] ss:$16 sps:$4 sm:$0xff]   ;;  %v1904_v3 = vld [vmem:[#allocation7 + $0x24] ss:$16 sps:$4 sm:$0xff]   ;;  %v87_v41 = vld [vmem:[#allocation4 + $0x8] sm:$0xff] }
  0x28   :  { %259 = vmatprep.subr.bf16.mxu0 %v1899_v1  ;;  %v1907_v4 = vld [vmem:[#allocation7 + $0x20] ss:$16 sps:$4 sm:$0xff]   ;;  %v1910_v5 = vld [vmem:[#allocation7 + $0x44] ss:$16 sps:$4 sm:$0xff]   ;;  %v1912_v6 = vld [vmem:[#allocation7 + $0xc] ss:$16 sps:$4 sm:$0xff]   ;;  %v92_v48 = vunpack.c.l.bf16 %v87_v41  ;;  %v93_v51 = vunpack.c.h.bf16 %v87_v41 }
  0x29   :  { %260 = vmatpush1.bf16.msra.mxu0 %v1901_v2  ;;  %2374 = vst [vmem:[#allocation14_spill] sm:$0xff] %v1912_v6  ;;  %v1914_v7 = vld [vmem:[#allocation7 + $0x8] ss:$16 sps:$4 sm:$0xff]   ;;  %v1917_v8 = vld [vmem:[#allocation7 + $0x40] ss:$16 sps:$4 sm:$0xff]   ;;  %302 = vmatprep.subr.bf16.mxu1 %v1912_v6  ;;  %s1855_s1 = smov [#allocation9]  }
  0x2a   :  { %261 = vmatprep.subr.bf16.mxu0 %v1904_v3  ;;  %v1919_v9 = vld [vmem:[#allocation7 + $0x64] ss:$16 sps:$4 sm:$0xff]   ;;  %v1923_v10 = vld [vmem:[#allocation7 + $0x2c] ss:$16 sps:$4 sm:$0xff]   ;;  %303 = vmatpush1.bf16.msra.mxu1 %v1914_v7  ;;  %v1926_v11 = vld [vmem:[#allocation7 + $0x28] ss:$16 sps:$4 sm:$0xff]  }
  0x2b   :  { %304 = vmatprep.subr.bf16.mxu1 %v1923_v10  ;;  %v1930_v12 = vld [vmem:[#allocation7 + $0x60] ss:$16 sps:$4 sm:$0xff]   ;;  %v1932_v13 = vld [vmem:[#allocation7 + $0x4c] ss:$16 sps:$4 sm:$0xff]   ;;  %v1935_v14 = vld [vmem:[#allocation7 + $0x84] ss:$16 sps:$4 sm:$0xff]  }
  0x2c   :  { %v1938_v15 = vld [vmem:[#allocation7 + $0x48] ss:$16 sps:$4 sm:$0xff]   ;;  %v1941_v16 = vld [vmem:[#allocation7 + $0x6c] ss:$16 sps:$4 sm:$0xff]   ;;  %v1944_v17 = vld [vmem:[#allocation7 + $0x80] ss:$16 sps:$4 sm:$0xff]  }
  0x2d   :  { %262 = vmatpush1.bf16.msra.mxu0 %v1907_v4  ;;  %v1947_v18 = vld [vmem:[#allocation7 + $0xa4] ss:$16 sps:$4 sm:$0xff]   ;;  %v1950_v19 = vld [vmem:[#allocation7 + $0x68] ss:$16 sps:$4 sm:$0xff]   ;;  %v1953_v20 = vld [vmem:[#allocation7 + $0x8c] ss:$16 sps:$4 sm:$0xff]  }
  0x2e   :  { %263 = vmatprep.subr.bf16.mxu0 %v1910_v5  ;;  %305 = vmatpush1.bf16.msra.mxu1 %v1926_v11  ;;  %v1956_v21 = vld [vmem:[#allocation7 + $0xa0] ss:$16 sps:$4 sm:$0xff]   ;;  %v1959_v22 = vld [vmem:[#allocation7 + $0xc4] ss:$16 sps:$4 sm:$0xff]   ;;  %v1962_v23 = vld [vmem:[#allocation7 + $0x88] ss:$16 sps:$4 sm:$0xff]  }
  0x2f   :  { %306 = vmatprep.subr.bf16.mxu1 %v1932_v13  ;;  %v1965_v24 = vld [vmem:[#allocation7 + $0xac] ss:$16 sps:$4 sm:$0xff]   ;;  %v1968_v25 = vld [vmem:[#allocation7 + $0xc0] ss:$16 sps:$4 sm:$0xff]   ;;  %v1971_v26 = vld [vmem:[#allocation7 + $0xe4] ss:$16 sps:$4 sm:$0xff]  }
  0x30   :  { %v1974_v27 = vld [vmem:[#allocation7 + $0xa8] ss:$16 sps:$4 sm:$0xff]   ;;  %v1977_v28 = vld [vmem:[#allocation7 + $0xcc] ss:$16 sps:$4 sm:$0xff]   ;;  %v1980_v29 = vld [vmem:[#allocation7 + $0xe0] ss:$16 sps:$4 sm:$0xff]  }
  0x31   :  { %264 = vmatpush1.bf16.msra.mxu0 %v1917_v8  ;;  %v1984_v30 = vld [vmem:[#allocation7 + $0xc8] ss:$16 sps:$4 sm:$0xff]   ;;  %v1987_v31 = vld [vmem:[#allocation7 + $0xec] ss:$16 sps:$4 sm:$0xff]   ;;  %v86_v34 = vld [vmem:[#allocation4] sm:$0xff]  ;;  %s1475_s6 = sshll.u32 %s1855_s1, 4  ;;  %s1476_s6 = int_to_ptr.vmem [resolvable:$true] %s1475_s6 }
  0x32   :  { %265 = vmatprep.subr.bf16.mxu0 %v1919_v9  ;;  %307 = vmatpush1.bf16.msra.mxu1 %v1938_v15  ;;  %v1992_v32 = vld [vmem:[#allocation7 + $0xe8] ss:$16 sps:$4 sm:$0xff]   ;;  %v88_v35 = vld [vmem:[#allocation4 + $0x10] sm:$0xff]  ;;  %v90_v36 = vunpack.c.l.bf16 %v86_v34  ;;  %v91_v39 = vunpack.c.h.bf16 %v86_v34  ;;  %s1821_s7 = scalar_lea.vmem %s1476_s6, 256  ;;  %p1826_p3 = scmp.lt.s32.totalorder %s1476_s6, %s1476_s6 }
  0x33   :  { %308 = vmatprep.subr.bf16.mxu1 %v1941_v16  ;;  %v94_v37 = vunpack.c.l.bf16 %v88_v35  ;;  %v95_v40 = vunpack.c.h.bf16 %v88_v35  ;;  %v89_v44 = vld [vmem:[#allocation4 + $0x18] sm:$0xff]  ;;  %p1822_p2 = scmp.ne.s32.totalorder %s1476_s6, %s1821_s7  ;;  %p1827_p4 = scmp.lt.s32.totalorder %s1821_s7, %s1821_s7 }
  0x34   :  { %v96_v53 = vunpack.c.l.bf16 %v89_v44  ;;  %v97_v56 = vunpack.c.h.bf16 %v89_v44 }
  0x35   :  { %266 = vmatpush1.bf16.msra.mxu0 %v1930_v12  ;;  %p1828_p5 = por %p1827_p4, %p1826_p3 }
  0x36   :  { %267 = vmatprep.subr.bf16.mxu0 %v1935_v14  ;;  %309 = vmatpush1.bf16.msra.mxu1 %v1950_v19 }
  0x37   :  { %310 = vmatprep.subr.bf16.mxu1 %v1953_v20  ;;  %p1829_p6 = pnand %p1828_p5, %p1822_p2 }
  0x39   :  { %268 = vmatpush1.bf16.msra.mxu0 %v1944_v17 }
  0x3a   :  { %269 = vmatprep.subr.bf16.mxu0 %v1947_v18  ;;  %311 = vmatpush1.bf16.msra.mxu1 %v1962_v23 }
  0x3b   :  { %312 = vmatprep.subr.bf16.mxu1 %v1965_v24 }
  0x3d   :  { %270 = vmatpush1.bf16.msra.mxu0 %v1956_v21 }
  0x3e   :  { %271 = vmatprep.subr.bf16.mxu0 %v1959_v22  ;;  %313 = vmatpush1.bf16.msra.mxu1 %v1974_v27 }
  0x3f   :  { %314 = vmatprep.subr.bf16.mxu1 %v1977_v28 }
  0x41   :  { %272 = vmatpush1.bf16.msra.mxu0 %v1968_v25 }
  0x42   :  { %273 = vmatprep.subr.bf16.mxu0 %v1971_v26  ;;  %315 = vmatpush1.bf16.msra.mxu1 %v1984_v30 }
  0x43   :  { %316 = vmatprep.subr.bf16.mxu1 %v1987_v31 }
  0x45   :  { %274 = vmatpush1.bf16.msra.mxu0 %v1980_v29 }
  0x46   :  { %411 = vmatprep.subr.bf16.mxu0 %v1899_v1  ;;  %317 = vmatpush1.bf16.msra.mxu1 %v1992_v32 }
  0x47   :  { %454 = vmatprep.subr.bf16.mxu1 %v1912_v6 }
  0x48   :  { %292 = vmatmul.mubr.bf16.vlgmr.msra.gmra.mrb[0].mxu0 %v1854_v33 }
  0x49   :  { %412 = vmatpush1.bf16.msra.mxu0 %v1901_v2  ;;  %443 = vmatprep.mubr.bf16.mxu0 %v2368_v0 }
  0x4a   :  { %413 = vmatprep.subr.bf16.mxu0 %v1904_v3  ;;  %335 = vmatmul.mubr.bf16.vlgmr.msra.gmra.mrb[0].mxu1 %v1854_v33 }
  0x4b   :  { %455 = vmatpush1.bf16.msra.mxu1 %v1914_v7  ;;  %486 = vmatprep.mubr.bf16.mxu1 %v2368_v0 }
  0x4c   :  { %456 = vmatprep.subr.bf16.mxu1 %v1923_v10 }
  0x4d   :  { %414 = vmatpush1.bf16.msra.mxu0 %v1907_v4 }
  0x4e   :  { %415 = vmatprep.subr.bf16.mxu0 %v1910_v5 }
  0x4f   :  { %457 = vmatpush1.bf16.msra.mxu1 %v1926_v11 }
  0x50   :  { %458 = vmatprep.subr.bf16.mxu1 %v1932_v13 }
  0x51   :  { %416 = vmatpush1.bf16.msra.mxu0 %v1917_v8 }
  0x52   :  { %417 = vmatprep.subr.bf16.mxu0 %v1919_v9 }
  0x53   :  { %459 = vmatpush1.bf16.msra.mxu1 %v1938_v15 }
  0x54   :  { %460 = vmatprep.subr.bf16.mxu1 %v1941_v16 }
  0x55   :  { %418 = vmatpush1.bf16.msra.mxu0 %v1930_v12 }
  0x56   :  { %419 = vmatprep.subr.bf16.mxu0 %v1935_v14 }
  0x57   :  { %461 = vmatpush1.bf16.msra.mxu1 %v1950_v19 }
  0x58   :  { %462 = vmatprep.subr.bf16.mxu1 %v1953_v20 }
  0x59   :  { %420 = vmatpush1.bf16.msra.mxu0 %v1944_v17 }
  0x5a   :  { %421 = vmatprep.subr.bf16.mxu0 %v1947_v18 }
  0x5b   :  { %463 = vmatpush1.bf16.msra.mxu1 %v1962_v23 }
  0x5c   :  { %464 = vmatprep.subr.bf16.mxu1 %v1965_v24 }
  0x5d   :  { %422 = vmatpush1.bf16.msra.mxu0 %v1956_v21 }
  0x5e   :  { %423 = vmatprep.subr.bf16.mxu0 %v1959_v22 }
  0x5f   :  { %465 = vmatpush1.bf16.msra.mxu1 %v1974_v27 }
  0x60   :  { %466 = vmatprep.subr.bf16.mxu1 %v1977_v28 }
  0x61   :  { %424 = vmatpush1.bf16.msra.mxu0 %v1968_v25 }
  0x62   :  { %425 = vmatprep.subr.bf16.mxu0 %v1971_v26 }
  0x63   :  { %467 = vmatpush1.bf16.msra.mxu1 %v1984_v30 }
  0x64   :  { %468 = vmatprep.subr.bf16.mxu1 %v1987_v31 }
  0x65   :  { %426 = vmatpush1.bf16.msra.mxu0 %v1980_v29 }
  0x66   :  { %563 = vmatprep.subr.bf16.mxu0 %v1899_v1 }
  0x67   :  { %469 = vmatpush1.bf16.msra.mxu1 %v1992_v32 }
  0x68   :  { %606 = vmatprep.subr.bf16.mxu1 %v1912_v6 }
 0x11b   :  { %v293_v38 = vpop.f32.mrb[0].mxu0 }
 0x11c   :  { %v295_v42 = vpop.f32.mrb[1].mxu0  ;;  %v345_v45 = vadd.f32 %v293_v38, %v90_v36 }
 0x11d   :  { %v297_v43 = vpop.f32.mrb[2].mxu0  ;;  %v346_v49 = vadd.f32 %v295_v42, %v91_v39  ;;  %v336_v55 = vpop.f32.mrb[0].mxu1 }
 0x11e   :  { %v349_v46 = vadd.f32 %v297_v43, %v94_v37  ;;  %v299_v47 = vpop.f32.mrb[3].mxu0  ;;  %v347_v58 = vadd.f32 %v336_v55, %v92_v48  ;;  %v338_v59 = vpop.f32.mrb[1].mxu1 }
 0x11f   :  { %v350_v50 = vadd.f32 %v299_v47, %v95_v40  ;;  %v348_v61 = vadd.f32 %v338_v59, %v93_v51  ;;  %v340_v62 = vpop.f32.mrb[2].mxu1 }
 0x120   :  { %v353_v52 = vpack.c.bf16 %v349_v46, %v345_v45  ;;  %v351_v63 = vadd.f32 %v340_v62, %v96_v53  ;;  %v342_v33 = vpop.f32.mrb[3].mxu1 }
 0x121   :  { %v354_v54 = vpack.c.bf16 %v350_v50, %v346_v49  ;;  %v352_v34 = vadd.f32 %v342_v33, %v97_v56 }
 0x122   :  { %v1520_v57 = vmul.bf16 3216621497, %v353_v52  ;;  %v355_v35 = vpack.c.bf16 %v351_v63, %v347_v58 }
 0x123   :  { %v1521_v60 = vmul.bf16 3216621497, %v354_v54  ;;  %v356_v36 = vpack.c.bf16 %v352_v34, %v348_v61 }
 0x124   :  { %1601 = vpow.bf16 %v1520_v57  ;;  %v1522_v37 = vmul.bf16 3216621497, %v355_v35 }
 0x125   :  { %1603 = vpow.bf16 %v1521_v60 }
 0x126   :  { %1605 = vpow.bf16 %v1522_v37 }
 0x127   :  { %1607 = vtanh.bf16 %v356_v36 }
 0x12f   :  { %v1602_v38 = vpop.eup %1601 }
 0x130   :  { %v1604_v39 = vpop.eup %1603  ;;  %v369_v40 = vadd.bf16 1065369472, %v1602_v38 }
 0x131   :  { %v370_v41 = vadd.bf16 1065369472, %v1604_v39  ;;  %v1606_v42 = vpop.eup %1605  ;;  %v398_v39 = vld [vmem:[#allocation4 + $0x20] sm:$0xff] }
 0x132   :  { %1609 = vrcp.bf16 %v369_v40  ;;  %v371_v43 = vadd.bf16 1065369472, %v1606_v42  ;;  %v1608_v44 = vpop.eup %1607  ;;  %v399_v40 = vld [vmem:[#allocation4 + $0x28] sm:$0xff]  ;;  %v401_v42 = vld [vmem:[#allocation4 + $0x38] sm:$0xff] }
 0x133   :  { %1611 = vrcp.bf16 %v370_v41  ;;  %v385_v51 = vunpack.c.l.bf16 %v1608_v44  ;;  %v386_v52 = vunpack.c.h.bf16 %v1608_v44  ;;  %v400_v41 = vld [vmem:[#allocation4 + $0x30] sm:$0xff]  ;;  %v404_v44 = vunpack.c.l.bf16 %v399_v40 }
 0x134   :  { %1613 = vrcp.bf16 %v371_v43  ;;  %v402_v43 = vunpack.c.l.bf16 %v398_v39 }
 0x13d   :  { %v1610_v45 = vpop.eup %1609 }
 0x13e   :  { %v1612_v46 = vpop.eup %1611  ;;  %v373_v47 = vmul.bf16 1065369472, %v1610_v45  ;;  %v406_v45 = vunpack.c.l.bf16 %v400_v41 }
 0x13f   :  { %v375_v48 = vmul.bf16 1065369472, %v1612_v46  ;;  %v1614_v61 = vpop.eup %1613  ;;  %v408_v46 = vunpack.c.l.bf16 %v401_v42 }
 0x140   :  { %v378_v49 = vunpack.c.l.bf16 %v373_v47  ;;  %v381_v50 = vunpack.c.h.bf16 %v373_v47  ;;  %v377_v62 = vmul.bf16 1065369472, %v1614_v61 }
 0x141   :  { %v379_v53 = vunpack.c.l.bf16 %v375_v48  ;;  %v382_v54 = vunpack.c.h.bf16 %v375_v48 }
 0x142   :  { %v389_v55 = vmul.f32 %v385_v51, %v378_v49  ;;  %v390_v56 = vmul.f32 %v386_v52, %v381_v50  ;;  %v380_v63 = vunpack.c.l.bf16 %v377_v62  ;;  %v383_v34 = vunpack.c.h.bf16 %v377_v62 }
 0x143   :  { %v387_v57 = vmul.f32 0.0, %v379_v53  ;;  %v388_v58 = vmul.f32 0.0, %v382_v54  ;;  %v403_v49 = vunpack.c.h.bf16 %v398_v39  ;;  %v405_v50 = vunpack.c.h.bf16 %v399_v40 }
 0x144   :  { %v407_v51 = vunpack.c.h.bf16 %v400_v41  ;;  %v409_v52 = vunpack.c.h.bf16 %v401_v42 }
 0x145   :  { %v2031_v59 = vadd.f32 %v389_v55, %v387_v57  ;;  %v2033_v60 = vadd.f32 %v390_v56, %v388_v58 }
 0x147   :  { %1615 = vtanh.f32 %v2031_v59 }
 0x148   :  { %1617 = vtanh.f32 %v2033_v60 }
 0x151   :  { %v1616_v33 = vpop.eup %1615 }
 0x152   :  { %v1618_v35 = vpop.eup %1617  ;;  %v395_v36 = vmul.f32 %v1616_v33, %v380_v63 }
 0x153   :  { %v396_v37 = vmul.f32 %v1618_v35, %v383_v34 }
 0x155   :  { %v410_v38 = vpack.c.bf16 %v396_v37, %v395_v36 }
 0x157   :  { %444 = vmatmul.mubr.bf16.vlgmr.msra.gmra.mrb[4].mxu0 %v410_v38  ;;  %487 = vmatmul.mubr.bf16.vlgmr.msra.gmra.mrb[4].mxu1 %v410_v38 }
 0x158   :  { %564 = vmatpush1.bf16.msra.mxu0 %v1901_v2  ;;  %607 = vmatpush1.bf16.msra.mxu1 %v1914_v7 }
 0x159   :  { %565 = vmatprep.subr.bf16.mxu0 %v1904_v3  ;;  %608 = vmatprep.subr.bf16.mxu1 %v1923_v10 }
 0x15a   :  { %595 = vmatprep.mubr.bf16.mxu0 %v2368_v0  ;;  %638 = vmatprep.mubr.bf16.mxu1 %v2368_v0 }
 0x15c   :  { %566 = vmatpush1.bf16.msra.mxu0 %v1907_v4  ;;  %609 = vmatpush1.bf16.msra.mxu1 %v1926_v11 }
 0x15d   :  { %567 = vmatprep.subr.bf16.mxu0 %v1910_v5  ;;  %610 = vmatprep.subr.bf16.mxu1 %v1932_v13 }
 0x160   :  { %568 = vmatpush1.bf16.msra.mxu0 %v1917_v8  ;;  %611 = vmatpush1.bf16.msra.mxu1 %v1938_v15 }
 0x161   :  { %569 = vmatprep.subr.bf16.mxu0 %v1919_v9  ;;  %612 = vmatprep.subr.bf16.mxu1 %v1941_v16 }
 0x164   :  { %570 = vmatpush1.bf16.msra.mxu0 %v1930_v12  ;;  %613 = vmatpush1.bf16.msra.mxu1 %v1950_v19 }
 0x165   :  { %571 = vmatprep.subr.bf16.mxu0 %v1935_v14  ;;  %614 = vmatprep.subr.bf16.mxu1 %v1953_v20 }
 0x168   :  { %572 = vmatpush1.bf16.msra.mxu0 %v1944_v17  ;;  %615 = vmatpush1.bf16.msra.mxu1 %v1962_v23 }
 0x169   :  { %573 = vmatprep.subr.bf16.mxu0 %v1947_v18  ;;  %616 = vmatprep.subr.bf16.mxu1 %v1965_v24 }
 0x16c   :  { %574 = vmatpush1.bf16.msra.mxu0 %v1956_v21  ;;  %617 = vmatpush1.bf16.msra.mxu1 %v1974_v27 }
 0x16d   :  { %575 = vmatprep.subr.bf16.mxu0 %v1959_v22  ;;  %618 = vmatprep.subr.bf16.mxu1 %v1977_v28 }
 0x170   :  { %576 = vmatpush1.bf16.msra.mxu0 %v1968_v25  ;;  %619 = vmatpush1.bf16.msra.mxu1 %v1984_v30 }
 0x171   :  { %577 = vmatprep.subr.bf16.mxu0 %v1971_v26  ;;  %620 = vmatprep.subr.bf16.mxu1 %v1987_v31 }
 0x174   :  { %578 = vmatpush1.bf16.msra.mxu0 %v1980_v29  ;;  %621 = vmatpush1.bf16.msra.mxu1 %v1992_v32 }
 0x175   :  { %715 = vmatprep.subr.bf16.mxu0 %v1899_v1  ;;  %758 = vmatprep.subr.bf16.mxu1 %v1912_v6 }
 0x22a   :  { %v445_v47 = vpop.f32.mrb[4].mxu0  ;;  %v488_v48 = vpop.f32.mrb[4].mxu1 }
 0x22b   :  { %v447_v53 = vpop.f32.mrb[5].mxu0  ;;  %v490_v54 = vpop.f32.mrb[5].mxu1  ;;  %v497_v57 = vadd.f32 %v445_v47, %v402_v43  ;;  %v499_v58 = vadd.f32 %v488_v48, %v404_v44 }
 0x22c   :  { %v449_v55 = vpop.f32.mrb[6].mxu0  ;;  %v492_v56 = vpop.f32.mrb[6].mxu1  ;;  %v498_v34 = vadd.f32 %v447_v53, %v403_v49  ;;  %v500_v35 = vadd.f32 %v490_v54, %v405_v50 }
 0x22d   :  { %v501_v61 = vadd.f32 %v449_v55, %v406_v45  ;;  %v503_v62 = vadd.f32 %v492_v56, %v408_v46  ;;  %v451_v63 = vpop.f32.mrb[7].mxu0  ;;  %v494_v33 = vpop.f32.mrb[7].mxu1 }
 0x22e   :  { %v502_v36 = vadd.f32 %v451_v63, %v407_v51  ;;  %v504_v37 = vadd.f32 %v494_v33, %v409_v52 }
 0x22f   :  { %v505_v38 = vpack.c.bf16 %v501_v61, %v497_v57  ;;  %v507_v0 = vpack.c.bf16 %v503_v62, %v499_v58 }
 0x230   :  { %v506_v39 = vpack.c.bf16 %v502_v36, %v498_v34  ;;  %v508_v40 = vpack.c.bf16 %v504_v37, %v500_v35 }
 0x231   :  { %v1523_v41 = vmul.bf16 3216621497, %v505_v38  ;;  %v1525_v6 = vmul.bf16 3216621497, %v507_v0 }
 0x232   :  { %v1524_v42 = vmul.bf16 3216621497, %v506_v39 }
 0x233   :  { %1619 = vpow.bf16 %v1523_v41 }
 0x234   :  { %1621 = vpow.bf16 %v1524_v42 }
 0x235   :  { %1623 = vpow.bf16 %v1525_v6 }
 0x236   :  { %1625 = vtanh.bf16 %v508_v40 }
 0x23e   :  { %v1620_v43 = vpop.eup %1619 }
 0x23f   :  { %v521_v44 = vadd.bf16 1065369472, %v1620_v43  ;;  %v1622_v45 = vpop.eup %1621 }
 0x240   :  { %v522_v46 = vadd.bf16 1065369472, %v1622_v45  ;;  %v1624_v47 = vpop.eup %1623  ;;  %v551_v45 = vld [vmem:[#allocation4 + $0x48] sm:$0xff] }
 0x241   :  { %1627 = vrcp.bf16 %v521_v44  ;;  %v523_v48 = vadd.bf16 1065369472, %v1624_v47  ;;  %v1626_v49 = vpop.eup %1625  ;;  %v550_v44 = vld [vmem:[#allocation4 + $0x40] sm:$0xff]  ;;  %v553_v47 = vld [vmem:[#allocation4 + $0x58] sm:$0xff] }
 0x242   :  { %1629 = vrcp.bf16 %v522_v46  ;;  %v537_v53 = vunpack.c.l.bf16 %v1626_v49  ;;  %v538_v0 = vunpack.c.h.bf16 %v1626_v49  ;;  %v552_v46 = vld [vmem:[#allocation4 + $0x50] sm:$0xff]  ;;  %v556_v49 = vunpack.c.l.bf16 %v551_v45 }
 0x243   :  { %1631 = vrcp.bf16 %v523_v48  ;;  %v554_v48 = vunpack.c.l.bf16 %v550_v44 }
 0x24c   :  { %v1628_v50 = vpop.eup %1627 }
 0x24d   :  { %v525_v51 = vmul.bf16 1065369472, %v1628_v50  ;;  %v1630_v52 = vpop.eup %1629  ;;  %v558_v50 = vunpack.c.l.bf16 %v552_v46 }
 0x24e   :  { %v527_v56 = vmul.bf16 1065369472, %v1630_v52  ;;  %v1632_v35 = vpop.eup %1631 }
 0x24f   :  { %v530_v54 = vunpack.c.l.bf16 %v525_v51  ;;  %v533_v55 = vunpack.c.h.bf16 %v525_v51  ;;  %v529_v36 = vmul.bf16 1065369472, %v1632_v35  ;;  %v560_v51 = vunpack.c.l.bf16 %v553_v47 }
 0x250   :  { %v531_v6 = vunpack.c.l.bf16 %v527_v56  ;;  %v534_v57 = vunpack.c.h.bf16 %v527_v56  ;;  %v559_v56 = vunpack.c.h.bf16 %v552_v46 }
 0x251   :  { %v541_v58 = vmul.f32 %v537_v53, %v530_v54  ;;  %v542_v61 = vmul.f32 %v538_v0, %v533_v55  ;;  %v532_v37 = vunpack.c.l.bf16 %v529_v36  ;;  %v535_v39 = vunpack.c.h.bf16 %v529_v36 }
 0x252   :  { %v539_v62 = vmul.f32 %v531_v6, %v2031_v59  ;;  %v540_v63 = vmul.f32 %v534_v57, %v2033_v60  ;;  %v2375_v59 = vmov 0   ;;  %v2376_v60 = vld [vmem:[#allocation14_spill] sm:$0xff]  ;;  %v555_v54 = vunpack.c.h.bf16 %v550_v44 }
 0x253   :  { %v557_v55 = vunpack.c.h.bf16 %v551_v45  ;;  %v561_v0 = vunpack.c.h.bf16 %v553_v47 }
 0x254   :  { %v2073_v33 = vadd.f32 %v541_v58, %v539_v62  ;;  %v2075_v34 = vadd.f32 %v542_v61, %v540_v63 }
 0x256   :  { %1633 = vtanh.f32 %v2073_v33 }
 0x257   :  { %1635 = vtanh.f32 %v2075_v34 }
 0x260   :  { %v1634_v38 = vpop.eup %1633 }
 0x261   :  { %v1636_v40 = vpop.eup %1635  ;;  %v547_v41 = vmul.f32 %v1634_v38, %v532_v37 }
 0x262   :  { %v548_v42 = vmul.f32 %v1636_v40, %v535_v39 }
 0x264   :  { %v562_v43 = vpack.c.bf16 %v548_v42, %v547_v41 }
 0x266   :  { %596 = vmatmul.mubr.bf16.vlgmr.msra.gmra.mrb[8].mxu0 %v562_v43  ;;  %639 = vmatmul.mubr.bf16.vlgmr.msra.gmra.mrb[8].mxu1 %v562_v43 }
 0x267   :  { %716 = vmatpush1.bf16.msra.mxu0 %v1901_v2  ;;  %759 = vmatpush1.bf16.msra.mxu1 %v1914_v7 }
 0x268   :  { %717 = vmatprep.subr.bf16.mxu0 %v1904_v3  ;;  %760 = vmatprep.subr.bf16.mxu1 %v1923_v10 }
 0x269   :  { %747 = vmatprep.mubr.bf16.mxu0 %v2375_v59  ;;  %790 = vmatprep.mubr.bf16.mxu1 %v2375_v59 }
 0x26b   :  { %718 = vmatpush1.bf16.msra.mxu0 %v1907_v4  ;;  %761 = vmatpush1.bf16.msra.mxu1 %v1926_v11 }
 0x26c   :  { %719 = vmatprep.subr.bf16.mxu0 %v1910_v5  ;;  %762 = vmatprep.subr.bf16.mxu1 %v1932_v13 }
 0x26f   :  { %720 = vmatpush1.bf16.msra.mxu0 %v1917_v8  ;;  %763 = vmatpush1.bf16.msra.mxu1 %v1938_v15 }
 0x270   :  { %721 = vmatprep.subr.bf16.mxu0 %v1919_v9  ;;  %764 = vmatprep.subr.bf16.mxu1 %v1941_v16 }
 0x273   :  { %722 = vmatpush1.bf16.msra.mxu0 %v1930_v12  ;;  %765 = vmatpush1.bf16.msra.mxu1 %v1950_v19 }
 0x274   :  { %723 = vmatprep.subr.bf16.mxu0 %v1935_v14  ;;  %766 = vmatprep.subr.bf16.mxu1 %v1953_v20 }
 0x277   :  { %724 = vmatpush1.bf16.msra.mxu0 %v1944_v17  ;;  %767 = vmatpush1.bf16.msra.mxu1 %v1962_v23 }
 0x278   :  { %725 = vmatprep.subr.bf16.mxu0 %v1947_v18  ;;  %768 = vmatprep.subr.bf16.mxu1 %v1965_v24 }
 0x27b   :  { %726 = vmatpush1.bf16.msra.mxu0 %v1956_v21  ;;  %769 = vmatpush1.bf16.msra.mxu1 %v1974_v27 }
 0x27c   :  { %727 = vmatprep.subr.bf16.mxu0 %v1959_v22  ;;  %770 = vmatprep.subr.bf16.mxu1 %v1977_v28 }
 0x27f   :  { %728 = vmatpush1.bf16.msra.mxu0 %v1968_v25  ;;  %771 = vmatpush1.bf16.msra.mxu1 %v1984_v30 }
 0x280   :  { %729 = vmatprep.subr.bf16.mxu0 %v1971_v26  ;;  %772 = vmatprep.subr.bf16.mxu1 %v1987_v31 }
 0x283   :  { %730 = vmatpush1.bf16.msra.mxu0 %v1980_v29  ;;  %773 = vmatpush1.bf16.msra.mxu1 %v1992_v32 }
 0x284   :  { %867 = vmatprep.subr.bf16.mxu0 %v1899_v1  ;;  %910 = vmatprep.subr.bf16.mxu1 %v2376_v60 }
 0x339   :  { %v597_v52 = vpop.f32.mrb[8].mxu0  ;;  %v640_v53 = vpop.f32.mrb[8].mxu1 }
 0x33a   :  { %v599_v6 = vpop.f32.mrb[9].mxu0  ;;  %v642_v57 = vpop.f32.mrb[9].mxu1  ;;  %v649_v62 = vadd.f32 %v597_v52, %v554_v48  ;;  %v651_v63 = vadd.f32 %v640_v53, %v556_v49 }
 0x33b   :  { %v601_v58 = vpop.f32.mrb[10].mxu0  ;;  %v644_v61 = vpop.f32.mrb[10].mxu1  ;;  %v650_v39 = vadd.f32 %v599_v6, %v555_v54  ;;  %v652_v40 = vadd.f32 %v642_v57, %v557_v55 }
 0x33c   :  { %v653_v35 = vadd.f32 %v601_v58, %v558_v50  ;;  %v655_v36 = vadd.f32 %v644_v61, %v560_v51  ;;  %v603_v37 = vpop.f32.mrb[11].mxu0  ;;  %v646_v38 = vpop.f32.mrb[11].mxu1 }
 0x33d   :  { %v654_v41 = vadd.f32 %v603_v37, %v559_v56  ;;  %v656_v42 = vadd.f32 %v646_v38, %v561_v0 }
 0x33e   :  { %v657_v43 = vpack.c.bf16 %v653_v35, %v649_v62  ;;  %v659_v60 = vpack.c.bf16 %v655_v36, %v651_v63 }
 0x33f   :  { %v658_v44 = vpack.c.bf16 %v654_v41, %v650_v39  ;;  %v660_v45 = vpack.c.bf16 %v656_v42, %v652_v40 }
 0x340   :  { %v1526_v46 = vmul.bf16 3216621497, %v657_v43  ;;  %v1528_v1 = vmul.bf16 3216621497, %v659_v60 }
 0x341   :  { %v1527_v47 = vmul.bf16 3216621497, %v658_v44 }
 0x342   :  { %1637 = vpow.bf16 %v1526_v46 }
 0x343   :  { %1639 = vpow.bf16 %v1527_v47 }
 0x344   :  { %1641 = vpow.bf16 %v1528_v1 }
 0x345   :  { %1643 = vtanh.bf16 %v660_v45 }
 0x34d   :  { %v1638_v48 = vpop.eup %1637 }
 0x34e   :  { %v673_v49 = vadd.bf16 1065369472, %v1638_v48  ;;  %v1640_v50 = vpop.eup %1639 }
 0x34f   :  { %v674_v51 = vadd.bf16 1065369472, %v1640_v50  ;;  %v1642_v52 = vpop.eup %1641 }
 0x350   :  { %1645 = vrcp.bf16 %v673_v49  ;;  %v675_v53 = vadd.bf16 1065369472, %v1642_v52  ;;  %v1644_v54 = vpop.eup %1643 }
 0x351   :  { %1647 = vrcp.bf16 %v674_v51  ;;  %v689_v6 = vunpack.c.l.bf16 %v1644_v54  ;;  %v690_v60 = vunpack.c.h.bf16 %v1644_v54 }
 0x352   :  { %1649 = vrcp.bf16 %v675_v53 }
 0x35b   :  { %v1646_v55 = vpop.eup %1645 }
 0x35c   :  { %v677_v56 = vmul.bf16 1065369472, %v1646_v55  ;;  %v1648_v0 = vpop.eup %1647 }
 0x35d   :  { %v679_v61 = vmul.bf16 1065369472, %v1648_v0  ;;  %v1650_v40 = vpop.eup %1649 }
 0x35e   :  { %v682_v57 = vunpack.c.l.bf16 %v677_v56  ;;  %v685_v58 = vunpack.c.h.bf16 %v677_v56  ;;  %v681_v41 = vmul.bf16 1065369472, %v1650_v40 }
 0x35f   :  { %v683_v1 = vunpack.c.l.bf16 %v679_v61  ;;  %v686_v62 = vunpack.c.h.bf16 %v679_v61 }
 0x360   :  { %v693_v63 = vmul.f32 %v689_v6, %v682_v57  ;;  %v694_v35 = vmul.f32 %v690_v60, %v685_v58  ;;  %v684_v42 = vunpack.c.l.bf16 %v681_v41  ;;  %v687_v44 = vunpack.c.h.bf16 %v681_v41 }
 0x361   :  { %v691_v36 = vmul.f32 %v683_v1, %v2073_v33  ;;  %v692_v37 = vmul.f32 %v686_v62, %v2075_v34 }
 0x363   :  { %v2115_v38 = vadd.f32 %v693_v63, %v691_v36  ;;  %v2117_v39 = vadd.f32 %v694_v35, %v692_v37 }
 0x365   :  { %1651 = vtanh.f32 %v2115_v38 }
 0x366   :  { %1653 = vtanh.f32 %v2117_v39 }
 0x36f   :  { %v1652_v43 = vpop.eup %1651 }
 0x370   :  { %v1654_v45 = vpop.eup %1653  ;;  %v699_v46 = vmul.f32 %v1652_v43, %v684_v42 }
 0x371   :  { %v700_v47 = vmul.f32 %v1654_v45, %v687_v44 }
 0x373   :  { %v714_v48 = vpack.c.bf16 %v700_v47, %v699_v46 }
 0x375   :  { %748 = vmatmul.mubr.bf16.vlgmr.msra.gmra.mrb[12].mxu0 %v714_v48  ;;  %791 = vmatmul.mubr.bf16.vlgmr.msra.gmra.mrb[12].mxu1 %v714_v48 }
 0x376   :  { %868 = vmatpush1.bf16.msra.mxu0 %v1901_v2  ;;  %911 = vmatpush1.bf16.msra.mxu1 %v1914_v7  ;;  %v2377_v2 = vld [vmem:[#allocation13_spill] sm:$0xff] }
 0x377   :  { %869 = vmatprep.subr.bf16.mxu0 %v1904_v3  ;;  %912 = vmatprep.subr.bf16.mxu1 %v1923_v10  ;;  %v2378_v3 = vld [vmem:[#allocation14_spill] sm:$0xff]  ;;  %v704_v7 = vld [vmem:[#allocation4 + $0x70] sm:$0xff] }
 0x378   :  { %899 = vmatprep.mubr.bf16.mxu0 %v2375_v59  ;;  %942 = vmatprep.mubr.bf16.mxu1 %v2375_v59 }
 0x37a   :  { %870 = vmatpush1.bf16.msra.mxu0 %v1907_v4  ;;  %913 = vmatpush1.bf16.msra.mxu1 %v1926_v11  ;;  %v702_v4 = vld [vmem:[#allocation4 + $0x60] sm:$0xff]  ;;  %v710_v11 = vunpack.c.l.bf16 %v704_v7 }
 0x37b   :  { %871 = vmatprep.subr.bf16.mxu0 %v1910_v5  ;;  %914 = vmatprep.subr.bf16.mxu1 %v1932_v13  ;;  %v703_v5 = vld [vmem:[#allocation4 + $0x68] sm:$0xff] }
 0x37c   :  { %v708_v10 = vunpack.c.l.bf16 %v703_v5 }
 0x37e   :  { %872 = vmatpush1.bf16.msra.mxu0 %v1917_v8  ;;  %915 = vmatpush1.bf16.msra.mxu1 %v1938_v15  ;;  %v705_v8 = vld [vmem:[#allocation4 + $0x78] sm:$0xff]  ;;  %v707_v15 = vunpack.c.h.bf16 %v702_v4 }
 0x37f   :  { %873 = vmatprep.subr.bf16.mxu0 %v1919_v9  ;;  %916 = vmatprep.subr.bf16.mxu1 %v1941_v16  ;;  %v706_v9 = vunpack.c.l.bf16 %v702_v4  ;;  %v709_v16 = vunpack.c.h.bf16 %v703_v5 }
 0x382   :  { %874 = vmatpush1.bf16.msra.mxu0 %v1930_v12  ;;  %917 = vmatpush1.bf16.msra.mxu1 %v1950_v19  ;;  %v712_v12 = vunpack.c.l.bf16 %v705_v8 }
 0x383   :  { %875 = vmatprep.subr.bf16.mxu0 %v1935_v14  ;;  %918 = vmatprep.subr.bf16.mxu1 %v1953_v20 }
 0x386   :  { %876 = vmatpush1.bf16.msra.mxu0 %v1944_v17  ;;  %919 = vmatpush1.bf16.msra.mxu1 %v1962_v23  ;;  %v711_v17 = vunpack.c.h.bf16 %v704_v7 }
 0x387   :  { %877 = vmatprep.subr.bf16.mxu0 %v1947_v18  ;;  %920 = vmatprep.subr.bf16.mxu1 %v1965_v24  ;;  %v713_v18 = vunpack.c.h.bf16 %v705_v8 }
 0x38a   :  { %878 = vmatpush1.bf16.msra.mxu0 %v1956_v21  ;;  %921 = vmatpush1.bf16.msra.mxu1 %v1974_v27 }
 0x38b   :  { %879 = vmatprep.subr.bf16.mxu0 %v1959_v22  ;;  %922 = vmatprep.subr.bf16.mxu1 %v1977_v28 }
 0x38e   :  { %880 = vmatpush1.bf16.msra.mxu0 %v1968_v25  ;;  %923 = vmatpush1.bf16.msra.mxu1 %v1984_v30 }
 0x38f   :  { %881 = vmatprep.subr.bf16.mxu0 %v1971_v26  ;;  %924 = vmatprep.subr.bf16.mxu1 %v1987_v31 }
 0x392   :  { %882 = vmatpush1.bf16.msra.mxu0 %v1980_v29  ;;  %925 = vmatpush1.bf16.msra.mxu1 %v1992_v32 }
 0x393   :  { %1019 = vmatprep.subr.bf16.mxu0 %v2377_v2  ;;  %1062 = vmatprep.subr.bf16.mxu1 %v2378_v3 }
 0x448   :  { %v749_v13 = vpop.f32.mrb[12].mxu0  ;;  %v792_v14 = vpop.f32.mrb[12].mxu1 }
 0x449   :  { %v751_v33 = vpop.f32.mrb[13].mxu0  ;;  %v794_v34 = vpop.f32.mrb[13].mxu1  ;;  %v801_v51 = vadd.f32 %v749_v13, %v706_v9  ;;  %v803_v52 = vadd.f32 %v792_v14, %v708_v10 }
 0x44a   :  { %v753_v49 = vpop.f32.mrb[14].mxu0  ;;  %v796_v50 = vpop.f32.mrb[14].mxu1  ;;  %v802_v0 = vadd.f32 %v751_v33, %v707_v15  ;;  %v804_v6 = vadd.f32 %v794_v34, %v709_v16 }
 0x44b   :  { %v805_v53 = vadd.f32 %v753_v49, %v710_v11  ;;  %v807_v54 = vadd.f32 %v796_v50, %v712_v12  ;;  %v755_v55 = vpop.f32.mrb[15].mxu0  ;;  %v798_v56 = vpop.f32.mrb[15].mxu1 }
 0x44c   :  { %v806_v57 = vadd.f32 %v755_v55, %v711_v17  ;;  %v808_v58 = vadd.f32 %v798_v56, %v713_v18  ;;  %v2177_v55 = vld [vmem:[#allocation7 + $0x20] ss:$16 sps:$4 sm:$0xff]   ;;  %v2180_v56 = vld [vmem:[#allocation7 + $0x28] ss:$16 sps:$4 sm:$0xff]  }
 0x44d   :  { %v809_v61 = vpack.c.bf16 %v805_v53, %v801_v51  ;;  %v811_v60 = vpack.c.bf16 %v807_v54, %v803_v52  ;;  %v2169_v53 = vld [vmem:[#allocation7 + $0x24] ss:$16 sps:$4 sm:$0xff]   ;;  %v2172_v54 = vld [vmem:[#allocation7 + $0x2c] ss:$16 sps:$4 sm:$0xff]  }
 0x44e   :  { %v810_v1 = vpack.c.bf16 %v806_v57, %v802_v0  ;;  %v812_v62 = vpack.c.bf16 %v808_v58, %v804_v6  ;;  %v2183_v0 = vld [vmem:[#allocation7 + $0x44] ss:$16 sps:$4 sm:$0xff]   ;;  %v2186_v6 = vld [vmem:[#allocation7 + $0x4c] ss:$16 sps:$4 sm:$0xff]   ;;  %v2189_v57 = vld [vmem:[#allocation7 + $0x40] ss:$16 sps:$4 sm:$0xff]  }
 0x44f   :  { %v1529_v63 = vmul.bf16 3216621497, %v809_v61  ;;  %v1531_v36 = vmul.bf16 3216621497, %v811_v60  ;;  %v2192_v58 = vld [vmem:[#allocation7 + $0x48] ss:$16 sps:$4 sm:$0xff]  }
 0x450   :  { %v1530_v35 = vmul.bf16 3216621497, %v810_v1  ;;  %v2195_v61 = vld [vmem:[#allocation7 + $0x64] ss:$16 sps:$4 sm:$0xff]   ;;  %v2198_v60 = vld [vmem:[#allocation7 + $0x6c] ss:$16 sps:$4 sm:$0xff]  }
 0x451   :  { %1655 = vpow.bf16 %v1529_v63  ;;  %v2201_v1 = vld [vmem:[#allocation7 + $0x60] ss:$16 sps:$4 sm:$0xff]  }
 0x452   :  { %1657 = vpow.bf16 %v1530_v35  ;;  %v2209_v63 = vld [vmem:[#allocation7 + $0x80] ss:$16 sps:$4 sm:$0xff]   ;;  %v2213_v35 = vld [vmem:[#allocation7 + $0xa4] ss:$16 sps:$4 sm:$0xff]  }
 0x453   :  { %1659 = vpow.bf16 %v1531_v36 }
 0x454   :  { %1661 = vtanh.bf16 %v812_v62  ;;  %v2205_v62 = vld [vmem:[#allocation7 + $0x84] ss:$16 sps:$4 sm:$0xff]  }
 0x45c   :  { %v1656_v37 = vpop.eup %1655 }
 0x45d   :  { %v825_v40 = vadd.bf16 1065369472, %v1656_v37  ;;  %v1658_v41 = vpop.eup %1657 }
 0x45e   :  { %v826_v42 = vadd.bf16 1065369472, %v1658_v41  ;;  %v1660_v43 = vpop.eup %1659 }
 0x45f   :  { %1663 = vrcp.bf16 %v825_v40  ;;  %v827_v44 = vadd.bf16 1065369472, %v1660_v43  ;;  %v1662_v45 = vpop.eup %1661 }
 0x460   :  { %1665 = vrcp.bf16 %v826_v42  ;;  %v841_v2 = vunpack.c.l.bf16 %v1662_v45  ;;  %v842_v7 = vunpack.c.h.bf16 %v1662_v45 }
 0x461   :  { %1667 = vrcp.bf16 %v827_v44 }
 0x46a   :  { %v1664_v46 = vpop.eup %1663 }
 0x46b   :  { %v829_v47 = vmul.bf16 1065369472, %v1664_v46  ;;  %v1666_v48 = vpop.eup %1665 }
 0x46c   :  { %v831_v5 = vmul.bf16 1065369472, %v1666_v48  ;;  %v1668_v16 = vpop.eup %1667 }
 0x46d   :  { %v834_v3 = vunpack.c.l.bf16 %v829_v47  ;;  %v837_v4 = vunpack.c.h.bf16 %v829_v47  ;;  %v833_v17 = vmul.bf16 1065369472, %v1668_v16 }
 0x46e   :  { %v835_v8 = vunpack.c.l.bf16 %v831_v5  ;;  %v838_v9 = vunpack.c.h.bf16 %v831_v5 }
 0x46f   :  { %v845_v10 = vmul.f32 %v841_v2, %v834_v3  ;;  %v846_v11 = vmul.f32 %v842_v7, %v837_v4  ;;  %v836_v18 = vunpack.c.l.bf16 %v833_v17  ;;  %v839_v34 = vunpack.c.h.bf16 %v833_v17 }
 0x470   :  { %v843_v12 = vmul.f32 %v835_v8, %v2115_v38  ;;  %v844_v13 = vmul.f32 %v838_v9, %v2117_v39  ;;  %v2163_v38 = vld [vmem:[#allocation7] ss:$16 sps:$4 sm:$0xff]   ;;  %v2166_v39 = vld [vmem:[#allocation7 + $0x8] ss:$16 sps:$4 sm:$0xff]  }
 0x472   :  { %v2157_v14 = vadd.f32 %v845_v10, %v843_v12  ;;  %v2159_v15 = vadd.f32 %v846_v11, %v844_v13 }
 0x474   :  { %1669 = vtanh.f32 %v2157_v14 }
 0x475   :  { %1671 = vtanh.f32 %v2159_v15 }
 0x47e   :  { %v1670_v33 = vpop.eup %1669 }
 0x47f   :  { %v1672_v49 = vpop.eup %1671  ;;  %v851_v50 = vmul.f32 %v1670_v33, %v836_v18 }
 0x480   :  { %v852_v51 = vmul.f32 %v1672_v49, %v839_v34 }
 0x482   :  { %v866_v52 = vpack.c.bf16 %v852_v51, %v851_v50 }
 0x484   :  { %900 = vmatmul.mubr.bf16.vlgmr.msra.gmra.mrb[16].mxu0 %v866_v52  ;;  %943 = vmatmul.mubr.bf16.vlgmr.msra.gmra.mrb[16].mxu1 %v866_v52 }
 0x485   :  { %1020 = vmatpush1.bf16.msra.mxu0 %v2163_v38  ;;  %1063 = vmatpush1.bf16.msra.mxu1 %v2166_v39 }
 0x486   :  { %1021 = vmatprep.subr.bf16.mxu0 %v2169_v53  ;;  %1064 = vmatprep.subr.bf16.mxu1 %v2172_v54 }
 0x487   :  { %1051 = vmatprep.mubr.bf16.mxu0 %v2375_v59  ;;  %1094 = vmatprep.mubr.bf16.mxu1 %v2375_v59 }
 0x489   :  { %1022 = vmatpush1.bf16.msra.mxu0 %v2177_v55  ;;  %1065 = vmatpush1.bf16.msra.mxu1 %v2180_v56 }
 0x48a   :  { %1023 = vmatprep.subr.bf16.mxu0 %v2183_v0  ;;  %1066 = vmatprep.subr.bf16.mxu1 %v2186_v6 }
 0x48d   :  { %1024 = vmatpush1.bf16.msra.mxu0 %v2189_v57  ;;  %1067 = vmatpush1.bf16.msra.mxu1 %v2192_v58 }
 0x48e   :  { %1025 = vmatprep.subr.bf16.mxu0 %v2195_v61  ;;  %1068 = vmatprep.subr.bf16.mxu1 %v2198_v60 }
 0x491   :  { %1026 = vmatpush1.bf16.msra.mxu0 %v2201_v1  ;;  %1069 = vmatpush1.bf16.msra.mxu1 %v1950_v19  ;;  %v2227_v19 = vld [vmem:[#allocation7 + $0x4] ss:$16 sps:$4 sm:$0xff]  }
 0x492   :  { %1027 = vmatprep.subr.bf16.mxu0 %v2205_v62  ;;  %1070 = vmatprep.subr.bf16.mxu1 %v1953_v20  ;;  %v2230_v20 = vld [vmem:[#allocation7 + $0xc] ss:$16 sps:$4 sm:$0xff]  }
 0x495   :  { %1028 = vmatpush1.bf16.msra.mxu0 %v2209_v63  ;;  %1071 = vmatpush1.bf16.msra.mxu1 %v1962_v23  ;;  %v856_v23 = vld [vmem:[#allocation4 + $0x90] sm:$0xff] }
 0x496   :  { %1029 = vmatprep.subr.bf16.mxu0 %v2213_v35  ;;  %1072 = vmatprep.subr.bf16.mxu1 %v1965_v24  ;;  %v857_v24 = vld [vmem:[#allocation4 + $0x98] sm:$0xff]  ;;  %v863_v36 = vunpack.c.h.bf16 %v856_v23 }
 0x497   :  { %v865_v37 = vunpack.c.h.bf16 %v857_v24 }
 0x499   :  { %1030 = vmatpush1.bf16.msra.mxu0 %v1956_v21  ;;  %1073 = vmatpush1.bf16.msra.mxu1 %v1974_v27  ;;  %v854_v21 = vld [vmem:[#allocation4 + $0x80] sm:$0xff]  ;;  %v862_v27 = vunpack.c.l.bf16 %v856_v23 }
 0x49a   :  { %1031 = vmatprep.subr.bf16.mxu0 %v1959_v22  ;;  %1074 = vmatprep.subr.bf16.mxu1 %v1977_v28  ;;  %v855_v22 = vld [vmem:[#allocation4 + $0x88] sm:$0xff]  ;;  %v864_v28 = vunpack.c.l.bf16 %v857_v24 }
 0x49d   :  { %1032 = vmatpush1.bf16.msra.mxu0 %v1968_v25  ;;  %1075 = vmatpush1.bf16.msra.mxu1 %v1984_v30  ;;  %v858_v25 = vunpack.c.l.bf16 %v854_v21 }
 0x49e   :  { %1033 = vmatprep.subr.bf16.mxu0 %v1971_v26  ;;  %1076 = vmatprep.subr.bf16.mxu1 %v1987_v31  ;;  %v860_v26 = vunpack.c.l.bf16 %v855_v22  ;;  %v859_v31 = vunpack.c.h.bf16 %v854_v21 }
 0x4a1   :  { %1034 = vmatpush1.bf16.msra.mxu0 %v1980_v29  ;;  %1077 = vmatpush1.bf16.msra.mxu1 %v1992_v32  ;;  %v861_v32 = vunpack.c.h.bf16 %v855_v22 }
 0x4a2   :  { %1171 = vmatprep.subr.bf16.mxu0 %v2227_v19  ;;  %1214 = vmatprep.subr.bf16.mxu1 %v2230_v20 }
 0x557   :  { %v901_v30 = vpop.f32.mrb[16].mxu0  ;;  %v944_v29 = vpop.f32.mrb[16].mxu1 }
 0x558   :  { %v903_v40 = vpop.f32.mrb[17].mxu0  ;;  %v946_v41 = vpop.f32.mrb[17].mxu1  ;;  %v953_v44 = vadd.f32 %v901_v30, %v858_v25  ;;  %v955_v45 = vadd.f32 %v944_v29, %v860_v26 }
 0x559   :  { %v905_v42 = vpop.f32.mrb[18].mxu0  ;;  %v948_v43 = vpop.f32.mrb[18].mxu1  ;;  %v954_v3 = vadd.f32 %v903_v40, %v859_v31  ;;  %v956_v4 = vadd.f32 %v946_v41, %v861_v32 }
 0x55a   :  { %v957_v46 = vadd.f32 %v905_v42, %v862_v27  ;;  %v959_v47 = vadd.f32 %v948_v43, %v864_v28  ;;  %v907_v48 = vpop.f32.mrb[19].mxu0  ;;  %v950_v2 = vpop.f32.mrb[19].mxu1 }
 0x55b   :  { %v958_v5 = vadd.f32 %v907_v48, %v863_v36  ;;  %v960_v7 = vadd.f32 %v950_v2, %v865_v37 }
 0x55c   :  { %v961_v8 = vpack.c.bf16 %v957_v46, %v953_v44  ;;  %v963_v9 = vpack.c.bf16 %v959_v47, %v955_v45 }
 0x55d   :  { %v962_v10 = vpack.c.bf16 %v958_v5, %v954_v3  ;;  %v964_v11 = vpack.c.bf16 %v960_v7, %v956_v4  ;;  %v2264_v3 = vld [vmem:[#allocation7 + $0x88] ss:$16 sps:$4 sm:$0xff]   ;;  %v2268_v4 = vld [vmem:[#allocation7 + $0xac] ss:$16 sps:$4 sm:$0xff]   ;;  %v2271_v5 = vld [vmem:[#allocation7 + $0xa0] ss:$16 sps:$4 sm:$0xff]  }
 0x55e   :  { %v1532_v12 = vmul.bf16 3216621497, %v961_v8  ;;  %v1534_v16 = vmul.bf16 3216621497, %v963_v9  ;;  %v2274_v7 = vld [vmem:[#allocation7 + $0xa8] ss:$16 sps:$4 sm:$0xff]  }
 0x55f   :  { %v1533_v13 = vmul.bf16 3216621497, %v962_v10  ;;  %v2277_v8 = vld [vmem:[#allocation7 + $0xc4] ss:$16 sps:$4 sm:$0xff]   ;;  %v2280_v9 = vld [vmem:[#allocation7 + $0xcc] ss:$16 sps:$4 sm:$0xff]  }
 0x560   :  { %1673 = vpow.bf16 %v1532_v12  ;;  %v2283_v10 = vld [vmem:[#allocation7 + $0xc0] ss:$16 sps:$4 sm:$0xff]   ;;  %v2289_v12 = vld [vmem:[#allocation7 + $0xe4] ss:$16 sps:$4 sm:$0xff]  }
 0x561   :  { %1675 = vpow.bf16 %v1533_v13  ;;  %v2292_v13 = vld [vmem:[#allocation7 + $0xec] ss:$16 sps:$4 sm:$0xff]  }
 0x562   :  { %1677 = vpow.bf16 %v1534_v16  ;;  %v2295_v16 = vld [vmem:[#allocation7 + $0xe0] ss:$16 sps:$4 sm:$0xff]  }
 0x563   :  { %1679 = vtanh.bf16 %v964_v11  ;;  %v2286_v11 = vld [vmem:[#allocation7 + $0xc8] ss:$16 sps:$4 sm:$0xff]  }
 0x56b   :  { %v1674_v17 = vpop.eup %1673 }
 0x56c   :  { %v977_v18 = vadd.bf16 1065369472, %v1674_v17  ;;  %v1676_v33 = vpop.eup %1675  ;;  %v2298_v17 = vld [vmem:[#allocation7 + $0xe8] ss:$16 sps:$4 sm:$0xff]  }
 0x56d   :  { %v978_v34 = vadd.bf16 1065369472, %v1676_v33  ;;  %v1678_v49 = vpop.eup %1677  ;;  %v1007_v33 = vld [vmem:[#allocation4 + $0xa8] sm:$0xff] }
 0x56e   :  { %1681 = vrcp.bf16 %v977_v18  ;;  %v979_v50 = vadd.bf16 1065369472, %v1678_v49  ;;  %v1680_v51 = vpop.eup %1679  ;;  %v1006_v18 = vld [vmem:[#allocation4 + $0xa0] sm:$0xff]  ;;  %v1009_v49 = vld [vmem:[#allocation4 + $0xb8] sm:$0xff] }
 0x56f   :  { %1683 = vrcp.bf16 %v978_v34  ;;  %v993_v23 = vunpack.c.l.bf16 %v1680_v51  ;;  %v994_v27 = vunpack.c.h.bf16 %v1680_v51  ;;  %v1008_v34 = vld [vmem:[#allocation4 + $0xb0] sm:$0xff]  ;;  %v1012_v51 = vunpack.c.l.bf16 %v1007_v33 }
 0x570   :  { %1685 = vrcp.bf16 %v979_v50  ;;  %v1010_v50 = vunpack.c.l.bf16 %v1006_v18 }
 0x579   :  { %v1682_v52 = vpop.eup %1681 }
 0x57a   :  { %v981_v21 = vmul.bf16 1065369472, %v1682_v52  ;;  %v1684_v22 = vpop.eup %1683  ;;  %v1014_v52 = vunpack.c.l.bf16 %v1008_v34 }
 0x57b   :  { %v983_v26 = vmul.bf16 1065369472, %v1684_v22  ;;  %v1686_v41 = vpop.eup %1685 }
 0x57c   :  { %v986_v24 = vunpack.c.l.bf16 %v981_v21  ;;  %v989_v25 = vunpack.c.h.bf16 %v981_v21  ;;  %v985_v42 = vmul.bf16 1065369472, %v1686_v41  ;;  %v1016_v21 = vunpack.c.l.bf16 %v1009_v49 }
 0x57d   :  { %v987_v28 = vunpack.c.l.bf16 %v983_v26  ;;  %v990_v30 = vunpack.c.h.bf16 %v983_v26  ;;  %v1015_v26 = vunpack.c.h.bf16 %v1008_v34 }
 0x57e   :  { %v997_v29 = vmul.f32 %v993_v23, %v986_v24  ;;  %v998_v31 = vmul.f32 %v994_v27, %v989_v25  ;;  %v988_v43 = vunpack.c.l.bf16 %v985_v42  ;;  %v991_v45 = vunpack.c.h.bf16 %v985_v42 }
 0x57f   :  { %v995_v32 = vmul.f32 %v987_v28, %v2157_v14  ;;  %v996_v36 = vmul.f32 %v990_v30, %v2159_v15  ;;  %v2256_v14 = vld [vmem:[#allocation7 + $0x68] ss:$16 sps:$4 sm:$0xff]   ;;  %v2260_v15 = vld [vmem:[#allocation7 + $0x8c] ss:$16 sps:$4 sm:$0xff]   ;;  %v1011_v24 = vunpack.c.h.bf16 %v1006_v18  ;;  %v1013_v25 = vunpack.c.h.bf16 %v1007_v33 }
 0x580   :  { %v1017_v27 = vunpack.c.h.bf16 %v1009_v49 }
 0x581   :  { %v2235_v37 = vadd.f32 %v997_v29, %v995_v32  ;;  %v2237_v40 = vadd.f32 %v998_v31, %v996_v36 }
 0x583   :  { %1687 = vtanh.f32 %v2235_v37 }
 0x584   :  { %1689 = vtanh.f32 %v2237_v40 }
 0x58d   :  { %v1688_v44 = vpop.eup %1687 }
 0x58e   :  { %v1690_v46 = vpop.eup %1689  ;;  %v1003_v47 = vmul.f32 %v1688_v44, %v988_v43 }
 0x58f   :  { %v1004_v48 = vmul.f32 %v1690_v46, %v991_v45 }
 0x591   :  { %v1018_v2 = vpack.c.bf16 %v1004_v48, %v1003_v47 }
 0x593   :  { %1052 = vmatmul.mubr.bf16.vlgmr.msra.gmra.mrb[20].mxu0 %v1018_v2  ;;  %1095 = vmatmul.mubr.bf16.vlgmr.msra.gmra.mrb[20].mxu1 %v1018_v2 }
 0x594   :  { %1172 = vmatpush1.bf16.msra.mxu0 %v2163_v38  ;;  %1215 = vmatpush1.bf16.msra.mxu1 %v2166_v39 }
 0x595   :  { %1173 = vmatprep.subr.bf16.mxu0 %v2169_v53  ;;  %1216 = vmatprep.subr.bf16.mxu1 %v2172_v54 }
 0x596   :  { %1203 = vmatprep.mubr.bf16.mxu0 %v2375_v59  ;;  %1246 = vmatprep.mubr.bf16.mxu1 %v2375_v59 }
 0x598   :  { %1174 = vmatpush1.bf16.msra.mxu0 %v2177_v55  ;;  %1217 = vmatpush1.bf16.msra.mxu1 %v2180_v56 }
 0x599   :  { %1175 = vmatprep.subr.bf16.mxu0 %v2183_v0  ;;  %1218 = vmatprep.subr.bf16.mxu1 %v2186_v6 }
 0x59c   :  { %1176 = vmatpush1.bf16.msra.mxu0 %v2189_v57  ;;  %1219 = vmatpush1.bf16.msra.mxu1 %v2192_v58 }
 0x59d   :  { %1177 = vmatprep.subr.bf16.mxu0 %v2195_v61  ;;  %1220 = vmatprep.subr.bf16.mxu1 %v2198_v60 }
 0x5a0   :  { %1178 = vmatpush1.bf16.msra.mxu0 %v2201_v1  ;;  %1221 = vmatpush1.bf16.msra.mxu1 %v2256_v14 }
 0x5a1   :  { %1179 = vmatprep.subr.bf16.mxu0 %v2205_v62  ;;  %1222 = vmatprep.subr.bf16.mxu1 %v2260_v15 }
 0x5a4   :  { %1180 = vmatpush1.bf16.msra.mxu0 %v2209_v63  ;;  %1223 = vmatpush1.bf16.msra.mxu1 %v2264_v3 }
 0x5a5   :  { %1181 = vmatprep.subr.bf16.mxu0 %v2213_v35  ;;  %1224 = vmatprep.subr.bf16.mxu1 %v2268_v4 }
 0x5a8   :  { %1182 = vmatpush1.bf16.msra.mxu0 %v2271_v5  ;;  %1225 = vmatpush1.bf16.msra.mxu1 %v2274_v7 }
 0x5a9   :  { %1183 = vmatprep.subr.bf16.mxu0 %v2277_v8  ;;  %1226 = vmatprep.subr.bf16.mxu1 %v2280_v9 }
 0x5ac   :  { %1184 = vmatpush1.bf16.msra.mxu0 %v2283_v10  ;;  %1227 = vmatpush1.bf16.msra.mxu1 %v2286_v11 }
 0x5ad   :  { %1185 = vmatprep.subr.bf16.mxu0 %v2289_v12  ;;  %1228 = vmatprep.subr.bf16.mxu1 %v2292_v13 }
 0x5b0   :  { %1186 = vmatpush1.bf16.msra.mxu0 %v2295_v16  ;;  %1229 = vmatpush1.bf16.msra.mxu1 %v2298_v17 }
 0x5b1   :  { %1323 = vmatprep.subr.bf16.mxu0 %v2227_v19  ;;  %1366 = vmatprep.subr.bf16.mxu1 %v2230_v20 }
 0x666   :  { %v1053_v22 = vpop.f32.mrb[20].mxu0  ;;  %v1096_v23 = vpop.f32.mrb[20].mxu1 }
 0x667   :  { %v1055_v28 = vpop.f32.mrb[21].mxu0  ;;  %v1098_v30 = vpop.f32.mrb[21].mxu1  ;;  %v1105_v31 = vadd.f32 %v1053_v22, %v1010_v50  ;;  %v1107_v20 = vadd.f32 %v1096_v23, %v1012_v51 }
 0x668   :  { %v1057_v29 = vpop.f32.mrb[22].mxu0  ;;  %v1100_v19 = vpop.f32.mrb[22].mxu1  ;;  %v1106_v43 = vadd.f32 %v1055_v28, %v1011_v24  ;;  %v1108_v44 = vadd.f32 %v1098_v30, %v1013_v25 }
 0x669   :  { %v1109_v32 = vadd.f32 %v1057_v29, %v1014_v52  ;;  %v1111_v36 = vadd.f32 %v1100_v19, %v1016_v21  ;;  %v1059_v41 = vpop.f32.mrb[23].mxu0  ;;  %v1102_v42 = vpop.f32.mrb[23].mxu1 }
 0x66a   :  { %v1110_v45 = vadd.f32 %v1059_v41, %v1015_v26  ;;  %v1112_v46 = vadd.f32 %v1102_v42, %v1017_v27 }
 0x66b   :  { %v1113_v47 = vpack.c.bf16 %v1109_v32, %v1105_v31  ;;  %v1115_v48 = vpack.c.bf16 %v1111_v36, %v1107_v20 }
 0x66c   :  { %v1114_v2 = vpack.c.bf16 %v1110_v45, %v1106_v43  ;;  %v1116_v18 = vpack.c.bf16 %v1112_v46, %v1108_v44 }
 0x66d   :  { %v1535_v33 = vmul.bf16 3216621497, %v1113_v47  ;;  %v1537_v49 = vmul.bf16 3216621497, %v1115_v48 }
 0x66e   :  { %v1536_v34 = vmul.bf16 3216621497, %v1114_v2 }
 0x66f   :  { %1691 = vpow.bf16 %v1535_v33 }
 0x670   :  { %1693 = vpow.bf16 %v1536_v34 }
 0x671   :  { %1695 = vpow.bf16 %v1537_v49 }
 0x672   :  { %1697 = vtanh.bf16 %v1116_v18 }
 0x67a   :  { %v1692_v50 = vpop.eup %1691 }
 0x67b   :  { %v1129_v51 = vadd.bf16 1065369472, %v1692_v50  ;;  %v1694_v52 = vpop.eup %1693 }
 0x67c   :  { %v1130_v21 = vadd.bf16 1065369472, %v1694_v52  ;;  %v1696_v22 = vpop.eup %1695 }
 0x67d   :  { %1699 = vrcp.bf16 %v1129_v51  ;;  %v1131_v23 = vadd.bf16 1065369472, %v1696_v22  ;;  %v1698_v24 = vpop.eup %1697 }
 0x67e   :  { %1701 = vrcp.bf16 %v1130_v21  ;;  %v1145_v28 = vunpack.c.l.bf16 %v1698_v24  ;;  %v1146_v31 = vunpack.c.h.bf16 %v1698_v24 }
 0x67f   :  { %1703 = vrcp.bf16 %v1131_v23 }
 0x688   :  { %v1700_v25 = vpop.eup %1699 }
 0x689   :  { %v1133_v26 = vmul.bf16 1065369472, %v1700_v25  ;;  %v1702_v27 = vpop.eup %1701 }
 0x68a   :  { %v1135_v19 = vmul.bf16 1065369472, %v1702_v27  ;;  %v1704_v46 = vpop.eup %1703 }
 0x68b   :  { %v1138_v30 = vunpack.c.l.bf16 %v1133_v26  ;;  %v1141_v29 = vunpack.c.h.bf16 %v1133_v26  ;;  %v1137_v47 = vmul.bf16 1065369472, %v1704_v46 }
 0x68c   :  { %v1139_v20 = vunpack.c.l.bf16 %v1135_v19  ;;  %v1142_v32 = vunpack.c.h.bf16 %v1135_v19 }
 0x68d   :  { %v1149_v36 = vmul.f32 %v1145_v28, %v1138_v30  ;;  %v1150_v41 = vmul.f32 %v1146_v31, %v1141_v29  ;;  %v1140_v48 = vunpack.c.l.bf16 %v1137_v47  ;;  %v1143_v18 = vunpack.c.h.bf16 %v1137_v47 }
 0x68e   :  { %v1147_v42 = vmul.f32 %v1139_v20, %v2235_v37  ;;  %v1148_v43 = vmul.f32 %v1142_v32, %v2237_v40 }
 0x690   :  { %v2305_v44 = vadd.f32 %v1149_v36, %v1147_v42  ;;  %v2307_v45 = vadd.f32 %v1150_v41, %v1148_v43 }
 0x692   :  { %1705 = vtanh.f32 %v2305_v44 }
 0x693   :  { %1707 = vtanh.f32 %v2307_v45 }
 0x69c   :  { %v1706_v2 = vpop.eup %1705 }
 0x69d   :  { %v1708_v33 = vpop.eup %1707  ;;  %v1155_v34 = vmul.f32 %v1706_v2, %v1140_v48 }
 0x69e   :  { %v1156_v49 = vmul.f32 %v1708_v33, %v1143_v18 }
 0x6a0   :  { %v1170_v50 = vpack.c.bf16 %v1156_v49, %v1155_v34 }
 0x6a2   :  { %1204 = vmatmul.mubr.bf16.vlgmr.msra.gmra.mrb[24].mxu0 %v1170_v50  ;;  %1247 = vmatmul.mubr.bf16.vlgmr.msra.gmra.mrb[24].mxu1 %v1170_v50 }
 0x6a3   :  { %1324 = vmatpush1.bf16.msra.mxu0 %v2163_v38  ;;  %1367 = vmatpush1.bf16.msra.mxu1 %v2166_v39  ;;  %v1159_v38 = vld [vmem:[#allocation4 + $0xc8] sm:$0xff]  ;;  %v1160_v39 = vld [vmem:[#allocation4 + $0xd0] sm:$0xff] }
 0x6a4   :  { %1325 = vmatprep.subr.bf16.mxu0 %v2169_v53  ;;  %1368 = vmatprep.subr.bf16.mxu1 %v2172_v54  ;;  %v1161_v53 = vld [vmem:[#allocation4 + $0xd8] sm:$0xff] }
 0x6a5   :  { %1355 = vmatprep.mubr.bf16.mxu0 %v2375_v59  ;;  %1398 = vmatprep.mubr.bf16.mxu1 %v2375_v59  ;;  %v1158_v59 = vld [vmem:[#allocation4 + $0xc0] sm:$0xff] }
 0x6a6   :  { %v1162_v54 = vunpack.c.l.bf16 %v1158_v59 }
 0x6a7   :  { %1326 = vmatpush1.bf16.msra.mxu0 %v2177_v55  ;;  %1369 = vmatpush1.bf16.msra.mxu1 %v2180_v56  ;;  %v1164_v55 = vunpack.c.l.bf16 %v1159_v38  ;;  %v1166_v56 = vunpack.c.l.bf16 %v1160_v39 }
 0x6a8   :  { %1327 = vmatprep.subr.bf16.mxu0 %v2183_v0  ;;  %1370 = vmatprep.subr.bf16.mxu1 %v2186_v6  ;;  %v1168_v0 = vunpack.c.l.bf16 %v1161_v53 }
 0x6ab   :  { %1328 = vmatpush1.bf16.msra.mxu0 %v2189_v57  ;;  %1371 = vmatpush1.bf16.msra.mxu1 %v2192_v58  ;;  %v1163_v58 = vunpack.c.h.bf16 %v1158_v59 }
 0x6ac   :  { %1329 = vmatprep.subr.bf16.mxu0 %v2195_v61  ;;  %1372 = vmatprep.subr.bf16.mxu1 %v2198_v60  ;;  %v1165_v61 = vunpack.c.h.bf16 %v1159_v38  ;;  %v1167_v60 = vunpack.c.h.bf16 %v1160_v39 }
 0x6af   :  { %1330 = vmatpush1.bf16.msra.mxu0 %v2201_v1  ;;  %1373 = vmatpush1.bf16.msra.mxu1 %v2256_v14  ;;  %v1169_v1 = vunpack.c.h.bf16 %v1161_v53 }
 0x6b0   :  { %1331 = vmatprep.subr.bf16.mxu0 %v2205_v62  ;;  %1374 = vmatprep.subr.bf16.mxu1 %v2260_v15 }
 0x6b3   :  { %1332 = vmatpush1.bf16.msra.mxu0 %v2209_v63  ;;  %1375 = vmatpush1.bf16.msra.mxu1 %v2264_v3 }
 0x6b4   :  { %1333 = vmatprep.subr.bf16.mxu0 %v2213_v35  ;;  %1376 = vmatprep.subr.bf16.mxu1 %v2268_v4 }
 0x6b7   :  { %1334 = vmatpush1.bf16.msra.mxu0 %v2271_v5  ;;  %1377 = vmatpush1.bf16.msra.mxu1 %v2274_v7 }
 0x6b8   :  { %1335 = vmatprep.subr.bf16.mxu0 %v2277_v8  ;;  %1378 = vmatprep.subr.bf16.mxu1 %v2280_v9 }
 0x6bb   :  { %1336 = vmatpush1.bf16.msra.mxu0 %v2283_v10  ;;  %1379 = vmatpush1.bf16.msra.mxu1 %v2286_v11 }
 0x6bc   :  { %1337 = vmatprep.subr.bf16.mxu0 %v2289_v12  ;;  %1380 = vmatprep.subr.bf16.mxu1 %v2292_v13 }
 0x6bf   :  { %1338 = vmatpush1.bf16.msra.mxu0 %v2295_v16  ;;  %1381 = vmatpush1.bf16.msra.mxu1 %v2298_v17 }
 0x775   :  { %v1205_v6 = vpop.f32.mrb[24].mxu0  ;;  %v1248_v57 = vpop.f32.mrb[24].mxu1 }
 0x776   :  { %v1207_v62 = vpop.f32.mrb[25].mxu0  ;;  %v1250_v63 = vpop.f32.mrb[25].mxu1  ;;  %v1257_v40 = vadd.f32 %v1205_v6, %v1162_v54  ;;  %v1259_v14 = vadd.f32 %v1248_v57, %v1164_v55  ;;  %v1312_v55 = vld [vmem:[#allocation4 + $0xf0] sm:$0xff] }
 0x777   :  { %v1209_v35 = vpop.f32.mrb[26].mxu0  ;;  %v1252_v37 = vpop.f32.mrb[26].mxu1  ;;  %v1258_v7 = vadd.f32 %v1207_v62, %v1163_v58  ;;  %v1260_v8 = vadd.f32 %v1250_v63, %v1165_v61  ;;  %v1318_v57 = vunpack.c.l.bf16 %v1312_v55  ;;  %v1319_v63 = vunpack.c.h.bf16 %v1312_v55 }
 0x778   :  { %v1261_v15 = vadd.f32 %v1209_v35, %v1166_v56  ;;  %v1263_v3 = vadd.f32 %v1252_v37, %v1168_v0  ;;  %v1211_v4 = vpop.f32.mrb[27].mxu0  ;;  %v1254_v5 = vpop.f32.mrb[27].mxu1  ;;  %v1313_v56 = vld [vmem:[#allocation4 + $0xf8] sm:$0xff] }
 0x779   :  { %v1262_v9 = vadd.f32 %v1211_v4, %v1167_v60  ;;  %v1264_v10 = vadd.f32 %v1254_v5, %v1169_v1  ;;  %v1320_v58 = vunpack.c.l.bf16 %v1313_v56  ;;  %v1321_v35 = vunpack.c.h.bf16 %v1313_v56 }
 0x77a   :  { %v1265_v11 = vpack.c.bf16 %v1261_v15, %v1257_v40  ;;  %v1267_v12 = vpack.c.bf16 %v1263_v3, %v1259_v14 }
 0x77b   :  { %v1266_v13 = vpack.c.bf16 %v1262_v9, %v1258_v7  ;;  %v1268_v16 = vpack.c.bf16 %v1264_v10, %v1260_v8 }
 0x77c   :  { %v1538_v17 = vmul.bf16 3216621497, %v1265_v11  ;;  %v1540_v52 = vmul.bf16 3216621497, %v1267_v12 }
 0x77d   :  { %v1539_v51 = vmul.bf16 3216621497, %v1266_v13 }
 0x77e   :  { %1709 = vpow.bf16 %v1538_v17 }
 0x77f   :  { %1711 = vpow.bf16 %v1539_v51 }
 0x780   :  { %1713 = vpow.bf16 %v1540_v52 }
 0x781   :  { %1715 = vtanh.bf16 %v1268_v16 }
 0x789   :  { %v1710_v21 = vpop.eup %1709 }
 0x78a   :  { %v1281_v22 = vadd.bf16 1065369472, %v1710_v21  ;;  %v1712_v23 = vpop.eup %1711 }
 0x78b   :  { %v1282_v24 = vadd.bf16 1065369472, %v1712_v23  ;;  %v1714_v25 = vpop.eup %1713 }
 0x78c   :  { %1717 = vrcp.bf16 %v1281_v22  ;;  %v1283_v26 = vadd.bf16 1065369472, %v1714_v25  ;;  %v1716_v27 = vpop.eup %1715 }
 0x78d   :  { %1719 = vrcp.bf16 %v1282_v24  ;;  %v1297_v19 = vunpack.c.l.bf16 %v1716_v27  ;;  %v1298_v36 = vunpack.c.h.bf16 %v1716_v27 }
 0x78e   :  { %1721 = vrcp.bf16 %v1283_v26 }
 0x797   :  { %v1718_v28 = vpop.eup %1717 }
 0x798   :  { %v1285_v30 = vmul.bf16 1065369472, %v1718_v28  ;;  %v1720_v29 = vpop.eup %1719 }
 0x799   :  { %v1287_v32 = vmul.bf16 1065369472, %v1720_v29  ;;  %v1722_v33 = vpop.eup %1721 }
 0x79a   :  { %v1290_v31 = vunpack.c.l.bf16 %v1285_v30  ;;  %v1293_v20 = vunpack.c.h.bf16 %v1285_v30  ;;  %v1289_v34 = vmul.bf16 1065369472, %v1722_v33 }
 0x79b   :  { %v1291_v41 = vunpack.c.l.bf16 %v1287_v32  ;;  %v1294_v42 = vunpack.c.h.bf16 %v1287_v32 }
 0x79c   :  { %v1301_v43 = vmul.f32 %v1297_v19, %v1290_v31  ;;  %v1302_v46 = vmul.f32 %v1298_v36, %v1293_v20  ;;  %v1292_v49 = vunpack.c.l.bf16 %v1289_v34  ;;  %v1295_v59 = vunpack.c.h.bf16 %v1289_v34 }
 0x79d   :  { %v1299_v47 = vmul.f32 %v1291_v41, %v2305_v44  ;;  %v1300_v48 = vmul.f32 %v1294_v42, %v2307_v45  ;;  %v1310_v44 = vld [vmem:[#allocation4 + $0xe0] sm:$0xff]  ;;  %v1311_v45 = vld [vmem:[#allocation4 + $0xe8] sm:$0xff] }
 0x79e   :  { %v1314_v0 = vunpack.c.l.bf16 %v1310_v44  ;;  %v1316_v6 = vunpack.c.l.bf16 %v1311_v45  ;;  %v1315_v1 = vunpack.c.h.bf16 %v1310_v44  ;;  %v1317_v62 = vunpack.c.h.bf16 %v1311_v45 }
 0x79f   :  { %v2345_v2 = vadd.f32 %v1301_v43, %v1299_v47  ;;  %v2347_v18 = vadd.f32 %v1302_v46, %v1300_v48 }
 0x7a1   :  { %1723 = vtanh.f32 %v2345_v2 }
 0x7a2   :  { %1725 = vtanh.f32 %v2347_v18 }
 0x7ab   :  { %v1724_v50 = vpop.eup %1723 }
 0x7ac   :  { %v1726_v38 = vpop.eup %1725  ;;  %v1307_v39 = vmul.f32 %v1724_v50, %v1292_v49 }
 0x7ad   :  { %v1308_v53 = vmul.f32 %v1726_v38, %v1295_v59 }
 0x7af   :  { %v1322_v54 = vpack.c.bf16 %v1308_v53, %v1307_v39 }
 0x7b1   :  { %1356 = vmatmul.mubr.bf16.vlgmr.msra.gmra.mrb[28].mxu0 %v1322_v54  ;;  %1399 = vmatmul.mubr.bf16.vlgmr.msra.gmra.mrb[28].mxu1 %v1322_v54 }
 0x884   :  { %v1357_v61 = vpop.f32.mrb[28].mxu0  ;;  %v1400_v60 = vpop.f32.mrb[28].mxu1 }
 0x885   :  { %v1359_v37 = vpop.f32.mrb[29].mxu0  ;;  %v1402_v40 = vpop.f32.mrb[29].mxu1  ;;  %v1409_v3 = vadd.f32 %v1357_v61, %v1314_v0  ;;  %v1411_v4 = vadd.f32 %v1400_v60, %v1316_v6 }
 0x886   :  { %v1361_v14 = vpop.f32.mrb[30].mxu0  ;;  %v1404_v15 = vpop.f32.mrb[30].mxu1  ;;  %v1410_v10 = vadd.f32 %v1359_v37, %v1315_v1  ;;  %v1412_v11 = vadd.f32 %v1402_v40, %v1317_v62 }
 0x887   :  { %v1413_v5 = vadd.f32 %v1361_v14, %v1318_v57  ;;  %v1415_v7 = vadd.f32 %v1404_v15, %v1320_v58  ;;  %v1363_v8 = vpop.f32.mrb[31].mxu0  ;;  %v1406_v9 = vpop.f32.mrb[31].mxu1 }
 0x888   :  { %v1414_v12 = vadd.f32 %v1363_v8, %v1319_v63  ;;  %v1416_v13 = vadd.f32 %v1406_v9, %v1321_v35 }
 0x889   :  { %v1417_v16 = vpack.c.bf16 %v1413_v5, %v1409_v3  ;;  %v1419_v17 = vpack.c.bf16 %v1415_v7, %v1411_v4 }
 0x88a   :  { %v1418_v51 = vpack.c.bf16 %v1414_v12, %v1410_v10  ;;  %v1420_v52 = vpack.c.bf16 %v1416_v13, %v1412_v11 }
 0x88b   :  { %v1541_v21 = vmul.bf16 3216621497, %v1417_v16  ;;  %v1543_v23 = vmul.bf16 3216621497, %v1419_v17 }
 0x88c   :  { %v1542_v22 = vmul.bf16 3216621497, %v1418_v51 }
 0x88d   :  { %1727 = vpow.bf16 %v1541_v21 }
 0x88e   :  { %1729 = vpow.bf16 %v1542_v22 }
 0x88f   :  { %1731 = vpow.bf16 %v1543_v23 }
 0x890   :  { %1733 = vtanh.bf16 %v1420_v52 }
 0x898   :  { %v1728_v24 = vpop.eup %1727 }
 0x899   :  { %v1433_v25 = vadd.bf16 1065369472, %v1728_v24  ;;  %v1730_v26 = vpop.eup %1729 }
 0x89a   :  { %v1434_v27 = vadd.bf16 1065369472, %v1730_v26  ;;  %v1732_v28 = vpop.eup %1731 }
 0x89b   :  { %1735 = vrcp.bf16 %v1433_v25  ;;  %v1435_v30 = vadd.bf16 1065369472, %v1732_v28  ;;  %v1734_v29 = vpop.eup %1733 }
 0x89c   :  { %1737 = vrcp.bf16 %v1434_v27  ;;  %v1449_v32 = vunpack.c.l.bf16 %v1734_v29  ;;  %v1450_v43 = vunpack.c.h.bf16 %v1734_v29 }
 0x89d   :  { %1739 = vrcp.bf16 %v1435_v30 }
 0x8a6   :  { %v1736_v19 = vpop.eup %1735 }
 0x8a7   :  { %v1437_v31 = vmul.bf16 1065369472, %v1736_v19  ;;  %v1738_v20 = vpop.eup %1737 }
 0x8a8   :  { %v1439_v42 = vmul.bf16 1065369472, %v1738_v20  ;;  %v1740_v38 = vpop.eup %1739 }
 0x8a9   :  { %v1442_v36 = vunpack.c.l.bf16 %v1437_v31  ;;  %v1445_v41 = vunpack.c.h.bf16 %v1437_v31  ;;  %v1441_v39 = vmul.bf16 1065369472, %v1740_v38 }
 0x8aa   :  { %v1443_v46 = vunpack.c.l.bf16 %v1439_v42  ;;  %v1446_v47 = vunpack.c.h.bf16 %v1439_v42 }
 0x8ab   :  { %v1453_v48 = vmul.f32 %v1449_v32, %v1442_v36  ;;  %v1454_v33 = vmul.f32 %v1450_v43, %v1445_v41  ;;  %v1444_v53 = vunpack.c.l.bf16 %v1441_v39  ;;  %v1447_v44 = vunpack.c.h.bf16 %v1441_v39 }
 0x8ac   :  { %v1451_v34 = vmul.f32 %v1443_v46, %v2345_v2  ;;  %v1452_v49 = vmul.f32 %v1446_v47, %v2347_v18 }
 0x8ae   :  { %v1455_v50 = vadd.f32 %v1453_v48, %v1451_v34  ;;  %v1456_v59 = vadd.f32 %v1454_v33, %v1452_v49 }
 0x8b0   :  { %1741 = vtanh.f32 %v1455_v50 }
 0x8b1   :  { %1743 = vtanh.f32 %v1456_v59 }
 0x8ba   :  { %v1742_v54 = vpop.eup %1741 }
 0x8bb   :  { %v1744_v45 = vpop.eup %1743  ;;  %v1459_v55 = vmul.f32 %v1742_v54, %v1444_v53 }
 0x8bc   :  { %v1460_v56 = vmul.f32 %v1744_v45, %v1447_v44 }
 0x8bd   :  { %1468 = vst [vmem:[#allocation9] sm:$0xff] %v1459_v55 }
 0x8be   :  { %1469 = vst [vmem:[#allocation9 + $0x8] sm:$0xff] %v1460_v56 }
 0x8bf   :  { %1832 = shalt.err (!%p1829_p6)
}
 0x8c0   :  { %s1833_s10 = scalar_lea.hbm %s2367_s2, 256 }
 0x8c1   :  { %p1834_p7 = scmp.ne.s32.totalorder %s2367_s2, %s1833_s10  ;;  %p1837_p8 = scmp.lt.u32.totalorder %s1833_s10, %s2367_s2 }
 0x8c3   :  { %p1839_p9 = pnand %p1837_p8, %p1834_p7 }
 0x8c5   :  { %1842 = shalt.err (!%p1839_p9)
}
 0x8c6   :  { %s1856_s15 = smov 128   ;;  %s1857_s16 = smov 8  }
 0x8c7   :  { %1481 = dma.vmem_to_hbm [thread:$0]  %s1476_s6, 256, %s2367_s2, [#allocation6], %s1856_s15, %s1856_s15, %s1857_s16  }
 0x8c8   :  { %1847 = dma.done.wait [#allocation6], 256  }
 0x8c9   :  { %1848 = vsyncadd [#allocation6], 4294967040 }
 0x8ca   :  { %1485 = vsyncpa [#allocation5], 1 }
 0x8cb   :  { %1486 = vsyncpa [#allocation8], 1 }
 0x8cc   :  { %1487 = vsyncpa [#allocation6], 1 }

</bundles_post_ra>
